<compile_context>
chip_gen: v5e
topology: v5e:2x2
jax: 0.10.0
libtpu: 0.0.40
codegen_flags: <defaults>
</compile_context>

<pallas_src>
import functools

import jax
import jax.numpy as jnp
from jax.experimental import pallas as pl
from jax.experimental.pallas import tpu as pltpu


def _bert_embeddings_kernel(eps, tile_s, seq_len, n_types,
                            ids_ref,              # SMEM (B*S,) int32 (scalar prefetch)
                            tt_ref,               # VMEM (1, TILE_S, 1) int32
                            pos_ref,              # VMEM (TILE_S, H)
                            type_tab_ref,         # VMEM (T, H)
                            gamma_ref, beta_ref,  # VMEM (1, H) f32
                            word_hbm_ref,         # ANY/HBM (V, H)
                            out_ref,              # VMEM (1, TILE_S, H)
                            stage_ref,            # VMEM (2, TILE_S, H) scratch
                            sems):                # DMA sems (2,)
    st = pl.program_id(0)            # sequence tile (outer, "parallel")
    b = pl.program_id(1)             # batch (inner, sequential -> prefetch order)
    n_b = pl.num_programs(1)
    s0 = st * tile_s
    slot = b % 2

    def issue_gather(batch_idx, slot_idx):
        """Start one row DMA per token of `batch_idx`'s tile into slot_idx."""
        base = batch_idx * seq_len + s0

        def body(r, carry):
            wid = ids_ref[base + r]
            pltpu.make_async_copy(
                word_hbm_ref.at[pl.ds(wid, 1), :],
                stage_ref.at[slot_idx, pl.ds(r, 1), :],
                sems.at[slot_idx]).start()
            return carry
        jax.lax.fori_loop(0, tile_s, body, 0, unroll=8)

    def wait_gather(slot_idx):
        def body(r, carry):
            # Dummy HBM row index: only the transfer sizes matter for wait().
            pltpu.make_async_copy(
                word_hbm_ref.at[pl.ds(0, 1), :],
                stage_ref.at[slot_idx, pl.ds(r, 1), :],
                sems.at[slot_idx]).wait()
            return carry
        jax.lax.fori_loop(0, tile_s, body, 0, unroll=8)

    # ---- 1) Prime: at the first batch of this sequence tile, gather the
    #        current tile's word rows (re-primed for every tile, so this is
    #        correct even when the tile axis is megacore-sharded).
    @pl.when(b == 0)
    def _():
        issue_gather(b, slot)

    # ---- 2) Cross-step prefetch: while computing batch b, gather batch b+1's
    #        rows for the same sequence tile into the other staging slot.
    @pl.when(b + 1 < n_b)
    def _():
        issue_gather(b + 1, 1 - slot)

    # ---- 3) Overlap DMA latency: position block + token-type select/MAC,
    #        fully vectorized over the (TILE_S, H) tile.
    acc = pos_ref[...].astype(jnp.float32)                      # (TILE_S, H)
    tt = tt_ref[0]                                              # (TILE_S, 1) int32
    for t in range(n_types):                                    # T is tiny (2..4)
        row = type_tab_ref[t:t + 1, :].astype(jnp.float32)      # (1, H)
        acc = acc + (tt == t).astype(jnp.float32) * row         # broadcast MAC

    # ---- 4) Wait for this batch's gathered rows and add them as one tile.
    wait_gather(slot)
    x = acc + stage_ref[slot].astype(jnp.float32)               # (TILE_S, H)

    # ---- 5) Fused LayerNorm over hidden, written straight to the output block.
    inv_h = 1.0 / x.shape[-1]
    mean = jnp.sum(x, axis=-1, keepdims=True) * inv_h
    centered = x - mean
    var = jnp.sum(centered * centered, axis=-1, keepdims=True) * inv_h
    y = centered * jax.lax.rsqrt(var + eps)
    # Dropout: inference mode -> identity.
    # TODO(synk): training-mode dropout (stateful PRNG mask) not implemented.
    out_ref[0] = (y * gamma_ref[...] + beta_ref[...]).astype(out_ref.dtype)


def _pick_tile_s(seq_len, cap=512):
    # Largest multiple-of-8 divisor of S, capped at `cap` (fewer grid steps,
    # bigger blocks -> closer to HBM roofline).
    assert seq_len % 8 == 0, "sequence length must be a multiple of 8 (pad inputs)"
    best = 8
    for t in range(8, min(seq_len, cap) + 1, 8):
        if seq_len % t == 0:
            best = t
    return best


def bert_embeddings(input_ids, token_type_ids,
                    word_emb, pos_emb, type_emb, gamma, beta,
                    *, eps=1e-12, out_dtype=None):
    B, S = input_ids.shape
    V, H = word_emb.shape
    P = pos_emb.shape[0]
    T = type_emb.shape[0]
    assert S <= P, "sequence longer than max_position_embeddings"
    out_dtype = word_emb.dtype if out_dtype is None else out_dtype

    tile_s = _pick_tile_s(S)
    n_s_tiles = S // tile_s

    gamma2 = gamma.reshape(1, H).astype(jnp.float32)
    beta2 = beta.reshape(1, H).astype(jnp.float32)
    # Clamp ids so an out-of-range token can never trigger an OOB HBM DMA
    # (nn.Embedding would raise; we clamp instead).
    ids_flat = jnp.clip(input_ids.astype(jnp.int32), 0, V - 1).reshape(-1)
    tt3 = token_type_ids.astype(jnp.int32).reshape(B, S, 1)

    kernel = functools.partial(_bert_embeddings_kernel, float(eps), tile_s, S, T)

    grid_spec = pltpu.PrefetchScalarGridSpec(
        num_scalar_prefetch=1,               # flattened ids -> SMEM (DMA addressing)
        grid=(n_s_tiles, B),                 # batch axis innermost (prefetch order)
        in_specs=[
            pl.BlockSpec((1, tile_s, 1), lambda st, b, ids: (b, st, 0)),  # token-type ids
            pl.BlockSpec((tile_s, H), lambda st, b, ids: (st, 0)),        # position rows
            pl.BlockSpec((T, H), lambda st, b, ids: (0, 0)),              # token-type table
            pl.BlockSpec((1, H), lambda st, b, ids: (0, 0)),              # gamma
            pl.BlockSpec((1, H), lambda st, b, ids: (0, 0)),              # beta
            pl.BlockSpec(memory_space=pl.ANY),                            # word table in HBM
        ],
        out_specs=pl.BlockSpec((1, tile_s, H), lambda st, b, ids: (b, st, 0)),
        scratch_shapes=[
            pltpu.VMEM((2, tile_s, H), word_emb.dtype),   # double-buffered gather staging
            pltpu.SemaphoreType.DMA((2,)),                # one sem per staging slot
        ],
    )

    isz = lambda d: jnp.dtype(d).itemsize
    cost = pl.CostEstimate(
        flops=int(10 * B * S * H),
        transcendentals=int(B * S),
        bytes_accessed=int(B * S * H * (isz(word_emb.dtype) + isz(out_dtype))
                           + S * H * isz(pos_emb.dtype)
                           + B * S * 8),
    )

    return pl.pallas_call(
        kernel,
        out_shape=jax.ShapeDtypeStruct((B, S, H), out_dtype),
        grid_spec=grid_spec,
        compiler_params=pltpu.CompilerParams(
            dimension_semantics=("parallel", "arbitrary"),
            vmem_limit_bytes=48 * 1024 * 1024),
        cost_estimate=cost,
    )(ids_flat, tt3, pos_emb, type_emb, gamma2, beta2, word_emb)


def reference(input_ids, token_type_ids, word_emb, pos_emb, type_emb, gamma, beta, eps=1e-12):
    B, S = input_ids.shape
    pos_ids = jnp.broadcast_to(jnp.arange(S), (B, S))
    x = word_emb[input_ids] + pos_emb[pos_ids] + type_emb[token_type_ids]
    mean = jnp.mean(x, axis=-1, keepdims=True)
    var = jnp.mean((x - mean) ** 2, axis=-1, keepdims=True)
    return (x - mean) * jax.lax.rsqrt(var + eps) * gamma + beta


if __name__ == "__main__":
    # Small BERT-like config.
    B, S, H = 2, 8, 128
    VOCAB, MAX_POS, TYPE_VOCAB = 64, 16, 2
    EPS = 1e-12

    key = jax.random.PRNGKey(0)
    k_w, k_p, k_t, k_ids, k_tt = jax.random.split(key, 5)

    # Deterministic parameter init (BERT-style N(0, 0.02)); padding_idx=0 row zeroed.
    word_emb = 0.02 * jax.random.normal(k_w, (VOCAB, H), jnp.float32)
    word_emb = word_emb.at[0].set(0.0)                       # nn.Embedding(padding_idx=0)
    pos_emb = 0.02 * jax.random.normal(k_p, (MAX_POS, H), jnp.float32)
    type_emb = 0.02 * jax.random.normal(k_t, (TYPE_VOCAB, H), jnp.float32)
    gamma = jnp.ones((H,), jnp.float32)
    beta = jnp.zeros((H,), jnp.float32)

    input_ids = jax.random.randint(k_ids, (B, S), 0, VOCAB, dtype=jnp.int32)
    token_type_ids = jax.random.randint(k_tt, (B, S), 0, TYPE_VOCAB, dtype=jnp.int32)

    # --- f32 path: strict check against the pure-JAX reference.
    out = bert_embeddings(input_ids, token_type_ids,
                          word_emb, pos_emb, type_emb, gamma, beta, eps=EPS)
    out = jax.block_until_ready(out)
    ref = reference(input_ids, token_type_ids, word_emb, pos_emb, type_emb,
                    gamma, beta, EPS)
    assert out.shape == (B, S, H) and out.dtype == jnp.float32
    assert jnp.allclose(out, ref, atol=1e-5, rtol=1e-5)

    # --- reduced-HBM-bytes path: bf16 position/type tables + bf16 output
    #     (f32 accumulation + LayerNorm inside the kernel), loose tolerance.
    pos_bf = pos_emb.astype(jnp.bfloat16)
    type_bf = type_emb.astype(jnp.bfloat16)
    out_bf = bert_embeddings(input_ids, token_type_ids,
                             word_emb, pos_bf, type_bf, gamma, beta,
                             eps=EPS, out_dtype=jnp.bfloat16)
    out_bf = jax.block_until_ready(out_bf)
    ref_bf = reference(input_ids, token_type_ids, word_emb,
                       pos_bf.astype(jnp.float32), type_bf.astype(jnp.float32),
                       gamma, beta, EPS)
    assert out_bf.dtype == jnp.bfloat16
    assert jnp.allclose(out_bf.astype(jnp.float32), ref_bf, atol=2e-2, rtol=2e-2)

    print("KERNEL_OK")
</pallas_src>

<mosaic_0001>
module attributes {stable_mosaic.version = 11 : i64} {
  func.func @_bert_embeddings_kernel(%arg0: i32, %arg1: i32, %arg2: memref<16xi32, #tpu.memory_space<smem>>, %arg3: memref<1x8x1xi32, #tpu.memory_space<vmem>>, %arg4: memref<8x128xf32, #tpu.memory_space<vmem>>, %arg5: memref<2x128xf32, #tpu.memory_space<vmem>>, %arg6: memref<1x128xf32, #tpu.memory_space<vmem>>, %arg7: memref<1x128xf32, #tpu.memory_space<vmem>>, %arg8: memref<64x128xf32, #tpu.memory_space<any>>, %arg9: memref<1x8x128xf32, #tpu.memory_space<vmem>>, %arg10: memref<2x8x128xf32, #tpu.memory_space<vmem>>, %arg11: memref<2x!tpu.dma_semaphore, #tpu.memory_space<semaphore_mem>>) attributes {dimension_semantics = [#tpu.dimension_semantics<parallel>, #tpu.dimension_semantics<arbitrary>], iteration_bounds = array<i64: 1, 2>, scalar_prefetch = 1 : i64, scratch_operands = 2 : i64, tpu.core_type = #tpu.core_type<tc>, window_params = [{transform_indices = @transform_0, window_bounds = array<i64: 1, 8, 1>}, {transform_indices = @transform_1, window_bounds = array<i64: 8, 128>}, {pipeline_mode = #tpu.pipeline_mode<synchronous>, transform_indices = @transform_2, window_bounds = array<i64: 2, 128>}, {pipeline_mode = #tpu.pipeline_mode<synchronous>, transform_indices = @transform_3, window_bounds = array<i64: 1, 128>}, {pipeline_mode = #tpu.pipeline_mode<synchronous>, transform_indices = @transform_4, window_bounds = array<i64: 1, 128>}, {}, {transform_indices = @transform_6, window_bounds = array<i64: 1, 8, 128>}]} {
    %c8_i32 = arith.constant 8 : i32
    %0 = arith.muli %arg0, %c8_i32 : i32
    %c2_i32 = arith.constant 2 : i32
    %c0_i32 = arith.constant 0 : i32
    %1 = arith.cmpi eq, %c2_i32, %c0_i32 : i32
    %c1_i32 = arith.constant 1 : i32
    %2 = arith.select %1, %c1_i32, %c2_i32 : i32
    %3 = arith.remsi %arg1, %2 : i32
    %c0_i32_0 = arith.constant 0 : i32
    %4 = arith.cmpi ne, %3, %c0_i32_0 : i32
    %c0_i32_1 = arith.constant 0 : i32
    %5 = arith.cmpi slt, %3, %c0_i32_1 : i32
    %c0_i32_2 = arith.constant 0 : i32
    %6 = arith.cmpi slt, %2, %c0_i32_2 : i32
    %7 = arith.xori %5, %6 : i1
    %8 = arith.andi %7, %4 : i1
    %9 = arith.addi %3, %2 : i32
    %10 = arith.select %8, %9, %3 : i32
    %c0_i32_3 = arith.constant 0 : i32
    %11 = arith.cmpi eq, %arg1, %c0_i32_3 : i32
    %12 = arith.extui %11 : i1 to i32
    %c0_i32_4 = arith.constant 0 : i32
    %13 = arith.cmpi ne, %12, %c0_i32_4 : i32
    scf.if %13 {
      %c8_i32_58 = arith.constant 8 : i32
      %108 = arith.muli %arg1, %c8_i32_58 : i32
      %109 = arith.addi %108, %0 : i32
      %c0_i32_59 = arith.constant 0 : i32
      %110 = arith.addi %109, %c0_i32_59 : i32
      %111 = arith.index_cast %110 : i32 to index
      %112 = memref.load %arg2[%111] : memref<16xi32, #tpu.memory_space<smem>>
      %c0_i32_60 = arith.constant 0 : i32
      %113 = tpu.memref_slice %arg8[%112, %c0_i32_60] : memref<64x128xf32, #tpu.memory_space<any>> -> memref<1x128xf32, #tpu.memory_space<any>>
      %c0_i32_61 = arith.constant 0 : i32
      %114 = tpu.memref_slice %arg10[%10, %c0_i32_59, %c0_i32_61] : memref<2x8x128xf32, #tpu.memory_space<vmem>> -> memref<1x1x128xf32, #tpu.memory_space<vmem>>
      %115 = tpu.memref_squeeze %114 : memref<1x1x128xf32, #tpu.memory_space<vmem>> -> memref<1x128xf32, #tpu.memory_space<vmem>>
      %116 = tpu.memref_slice %arg11[%10] : memref<2x!tpu.dma_semaphore, #tpu.memory_space<semaphore_mem>> -> memref<1x!tpu.dma_semaphore, #tpu.memory_space<semaphore_mem>>
      %117 = tpu.memref_squeeze %116 : memref<1x!tpu.dma_semaphore, #tpu.memory_space<semaphore_mem>> -> memref<!tpu.dma_semaphore, #tpu.memory_space<semaphore_mem>>
      tpu.enqueue_dma source(%113 : memref<1x128xf32, #tpu.memory_space<any>>) target(%115 : memref<1x128xf32, #tpu.memory_space<vmem>>) target_semaphore(%117 : memref<!tpu.dma_semaphore, #tpu.memory_space<semaphore_mem>>)
      %c1_i32_62 = arith.constant 1 : i32
      %118 = arith.addi %109, %c1_i32_62 : i32
      %119 = arith.index_cast %118 : i32 to index
      %120 = memref.load %arg2[%119] : memref<16xi32, #tpu.memory_space<smem>>
      %c0_i32_63 = arith.constant 0 : i32
      %121 = tpu.memref_slice %arg8[%120, %c0_i32_63] : memref<64x128xf32, #tpu.memory_space<any>> -> memref<1x128xf32, #tpu.memory_space<any>>
      %c0_i32_64 = arith.constant 0 : i32
      %122 = tpu.memref_slice %arg10[%10, %c1_i32_62, %c0_i32_64] : memref<2x8x128xf32, #tpu.memory_space<vmem>> -> memref<1x1x128xf32, #tpu.memory_space<vmem>>
      %123 = tpu.memref_squeeze %122 : memref<1x1x128xf32, #tpu.memory_space<vmem>> -> memref<1x128xf32, #tpu.memory_space<vmem>>
      %124 = tpu.memref_slice %arg11[%10] : memref<2x!tpu.dma_semaphore, #tpu.memory_space<semaphore_mem>> -> memref<1x!tpu.dma_semaphore, #tpu.memory_space<semaphore_mem>>
      %125 = tpu.memref_squeeze %124 : memref<1x!tpu.dma_semaphore, #tpu.memory_space<semaphore_mem>> -> memref<!tpu.dma_semaphore, #tpu.memory_space<semaphore_mem>>
      tpu.enqueue_dma source(%121 : memref<1x128xf32, #tpu.memory_space<any>>) target(%123 : memref<1x128xf32, #tpu.memory_space<vmem>>) target_semaphore(%125 : memref<!tpu.dma_semaphore, #tpu.memory_space<semaphore_mem>>)
      %c2_i32_65 = arith.constant 2 : i32
      %126 = arith.addi %109, %c2_i32_65 : i32
      %127 = arith.index_cast %126 : i32 to index
      %128 = memref.load %arg2[%127] : memref<16xi32, #tpu.memory_space<smem>>
      %c0_i32_66 = arith.constant 0 : i32
      %129 = tpu.memref_slice %arg8[%128, %c0_i32_66] : memref<64x128xf32, #tpu.memory_space<any>> -> memref<1x128xf32, #tpu.memory_space<any>>
      %c0_i32_67 = arith.constant 0 : i32
      %130 = tpu.memref_slice %arg10[%10, %c2_i32_65, %c0_i32_67] : memref<2x8x128xf32, #tpu.memory_space<vmem>> -> memref<1x1x128xf32, #tpu.memory_space<vmem>>
      %131 = tpu.memref_squeeze %130 : memref<1x1x128xf32, #tpu.memory_space<vmem>> -> memref<1x128xf32, #tpu.memory_space<vmem>>
      %132 = tpu.memref_slice %arg11[%10] : memref<2x!tpu.dma_semaphore, #tpu.memory_space<semaphore_mem>> -> memref<1x!tpu.dma_semaphore, #tpu.memory_space<semaphore_mem>>
      %133 = tpu.memref_squeeze %132 : memref<1x!tpu.dma_semaphore, #tpu.memory_space<semaphore_mem>> -> memref<!tpu.dma_semaphore, #tpu.memory_space<semaphore_mem>>
      tpu.enqueue_dma source(%129 : memref<1x128xf32, #tpu.memory_space<any>>) target(%131 : memref<1x128xf32, #tpu.memory_space<vmem>>) target_semaphore(%133 : memref<!tpu.dma_semaphore, #tpu.memory_space<semaphore_mem>>)
      %c3_i32_68 = arith.constant 3 : i32
      %134 = arith.addi %109, %c3_i32_68 : i32
      %135 = arith.index_cast %134 : i32 to index
      %136 = memref.load %arg2[%135] : memref<16xi32, #tpu.memory_space<smem>>
      %c0_i32_69 = arith.constant 0 : i32
      %137 = tpu.memref_slice %arg8[%136, %c0_i32_69] : memref<64x128xf32, #tpu.memory_space<any>> -> memref<1x128xf32, #tpu.memory_space<any>>
      %c0_i32_70 = arith.constant 0 : i32
      %138 = tpu.memref_slice %arg10[%10, %c3_i32_68, %c0_i32_70] : memref<2x8x128xf32, #tpu.memory_space<vmem>> -> memref<1x1x128xf32, #tpu.memory_space<vmem>>
      %139 = tpu.memref_squeeze %138 : memref<1x1x128xf32, #tpu.memory_space<vmem>> -> memref<1x128xf32, #tpu.memory_space<vmem>>
      %140 = tpu.memref_slice %arg11[%10] : memref<2x!tpu.dma_semaphore, #tpu.memory_space<semaphore_mem>> -> memref<1x!tpu.dma_semaphore, #tpu.memory_space<semaphore_mem>>
      %141 = tpu.memref_squeeze %140 : memref<1x!tpu.dma_semaphore, #tpu.memory_space<semaphore_mem>> -> memref<!tpu.dma_semaphore, #tpu.memory_space<semaphore_mem>>
      tpu.enqueue_dma source(%137 : memref<1x128xf32, #tpu.memory_space<any>>) target(%139 : memref<1x128xf32, #tpu.memory_space<vmem>>) target_semaphore(%141 : memref<!tpu.dma_semaphore, #tpu.memory_space<semaphore_mem>>)
      %c4_i32_71 = arith.constant 4 : i32
      %142 = arith.addi %109, %c4_i32_71 : i32
      %143 = arith.index_cast %142 : i32 to index
      %144 = memref.load %arg2[%143] : memref<16xi32, #tpu.memory_space<smem>>
      %c0_i32_72 = arith.constant 0 : i32
      %145 = tpu.memref_slice %arg8[%144, %c0_i32_72] : memref<64x128xf32, #tpu.memory_space<any>> -> memref<1x128xf32, #tpu.memory_space<any>>
      %c0_i32_73 = arith.constant 0 : i32
      %146 = tpu.memref_slice %arg10[%10, %c4_i32_71, %c0_i32_73] : memref<2x8x128xf32, #tpu.memory_space<vmem>> -> memref<1x1x128xf32, #tpu.memory_space<vmem>>
      %147 = tpu.memref_squeeze %146 : memref<1x1x128xf32, #tpu.memory_space<vmem>> -> memref<1x128xf32, #tpu.memory_space<vmem>>
      %148 = tpu.memref_slice %arg11[%10] : memref<2x!tpu.dma_semaphore, #tpu.memory_space<semaphore_mem>> -> memref<1x!tpu.dma_semaphore, #tpu.memory_space<semaphore_mem>>
      %149 = tpu.memref_squeeze %148 : memref<1x!tpu.dma_semaphore, #tpu.memory_space<semaphore_mem>> -> memref<!tpu.dma_semaphore, #tpu.memory_space<semaphore_mem>>
      tpu.enqueue_dma source(%145 : memref<1x128xf32, #tpu.memory_space<any>>) target(%147 : memref<1x128xf32, #tpu.memory_space<vmem>>) target_semaphore(%149 : memref<!tpu.dma_semaphore, #tpu.memory_space<semaphore_mem>>)
      %c5_i32_74 = arith.constant 5 : i32
      %150 = arith.addi %109, %c5_i32_74 : i32
      %151 = arith.index_cast %150 : i32 to index
      %152 = memref.load %arg2[%151] : memref<16xi32, #tpu.memory_space<smem>>
      %c0_i32_75 = arith.constant 0 : i32
      %153 = tpu.memref_slice %arg8[%152, %c0_i32_75] : memref<64x128xf32, #tpu.memory_space<any>> -> memref<1x128xf32, #tpu.memory_space<any>>
      %c0_i32_76 = arith.constant 0 : i32
      %154 = tpu.memref_slice %arg10[%10, %c5_i32_74, %c0_i32_76] : memref<2x8x128xf32, #tpu.memory_space<vmem>> -> memref<1x1x128xf32, #tpu.memory_space<vmem>>
      %155 = tpu.memref_squeeze %154 : memref<1x1x128xf32, #tpu.memory_space<vmem>> -> memref<1x128xf32, #tpu.memory_space<vmem>>
      %156 = tpu.memref_slice %arg11[%10] : memref<2x!tpu.dma_semaphore, #tpu.memory_space<semaphore_mem>> -> memref<1x!tpu.dma_semaphore, #tpu.memory_space<semaphore_mem>>
      %157 = tpu.memref_squeeze %156 : memref<1x!tpu.dma_semaphore, #tpu.memory_space<semaphore_mem>> -> memref<!tpu.dma_semaphore, #tpu.memory_space<semaphore_mem>>
      tpu.enqueue_dma source(%153 : memref<1x128xf32, #tpu.memory_space<any>>) target(%155 : memref<1x128xf32, #tpu.memory_space<vmem>>) target_semaphore(%157 : memref<!tpu.dma_semaphore, #tpu.memory_space<semaphore_mem>>)
      %c6_i32_77 = arith.constant 6 : i32
      %158 = arith.addi %109, %c6_i32_77 : i32
      %159 = arith.index_cast %158 : i32 to index
      %160 = memref.load %arg2[%159] : memref<16xi32, #tpu.memory_space<smem>>
      %c0_i32_78 = arith.constant 0 : i32
      %161 = tpu.memref_slice %arg8[%160, %c0_i32_78] : memref<64x128xf32, #tpu.memory_space<any>> -> memref<1x128xf32, #tpu.memory_space<any>>
      %c0_i32_79 = arith.constant 0 : i32
      %162 = tpu.memref_slice %arg10[%10, %c6_i32_77, %c0_i32_79] : memref<2x8x128xf32, #tpu.memory_space<vmem>> -> memref<1x1x128xf32, #tpu.memory_space<vmem>>
      %163 = tpu.memref_squeeze %162 : memref<1x1x128xf32, #tpu.memory_space<vmem>> -> memref<1x128xf32, #tpu.memory_space<vmem>>
      %164 = tpu.memref_slice %arg11[%10] : memref<2x!tpu.dma_semaphore, #tpu.memory_space<semaphore_mem>> -> memref<1x!tpu.dma_semaphore, #tpu.memory_space<semaphore_mem>>
      %165 = tpu.memref_squeeze %164 : memref<1x!tpu.dma_semaphore, #tpu.memory_space<semaphore_mem>> -> memref<!tpu.dma_semaphore, #tpu.memory_space<semaphore_mem>>
      tpu.enqueue_dma source(%161 : memref<1x128xf32, #tpu.memory_space<any>>) target(%163 : memref<1x128xf32, #tpu.memory_space<vmem>>) target_semaphore(%165 : memref<!tpu.dma_semaphore, #tpu.memory_space<semaphore_mem>>)
      %c7_i32_80 = arith.constant 7 : i32
      %166 = arith.addi %109, %c7_i32_80 : i32
      %167 = arith.index_cast %166 : i32 to index
      %168 = memref.load %arg2[%167] : memref<16xi32, #tpu.memory_space<smem>>
      %c0_i32_81 = arith.constant 0 : i32
      %169 = tpu.memref_slice %arg8[%168, %c0_i32_81] : memref<64x128xf32, #tpu.memory_space<any>> -> memref<1x128xf32, #tpu.memory_space<any>>
      %c0_i32_82 = arith.constant 0 : i32
      %170 = tpu.memref_slice %arg10[%10, %c7_i32_80, %c0_i32_82] : memref<2x8x128xf32, #tpu.memory_space<vmem>> -> memref<1x1x128xf32, #tpu.memory_space<vmem>>
      %171 = tpu.memref_squeeze %170 : memref<1x1x128xf32, #tpu.memory_space<vmem>> -> memref<1x128xf32, #tpu.memory_space<vmem>>
      %172 = tpu.memref_slice %arg11[%10] : memref<2x!tpu.dma_semaphore, #tpu.memory_space<semaphore_mem>> -> memref<1x!tpu.dma_semaphore, #tpu.memory_space<semaphore_mem>>
      %173 = tpu.memref_squeeze %172 : memref<1x!tpu.dma_semaphore, #tpu.memory_space<semaphore_mem>> -> memref<!tpu.dma_semaphore, #tpu.memory_space<semaphore_mem>>
      tpu.enqueue_dma source(%169 : memref<1x128xf32, #tpu.memory_space<any>>) target(%171 : memref<1x128xf32, #tpu.memory_space<vmem>>) target_semaphore(%173 : memref<!tpu.dma_semaphore, #tpu.memory_space<semaphore_mem>>)
      %c8_i32_83 = arith.constant 8 : i32
    } else {
    }
    %c1_i32_5 = arith.constant 1 : i32
    %14 = arith.addi %arg1, %c1_i32_5 : i32
    %c2_i32_6 = arith.constant 2 : i32
    %15 = arith.cmpi slt, %14, %c2_i32_6 : i32
    %16 = arith.extui %15 : i1 to i32
    %c0_i32_7 = arith.constant 0 : i32
    %17 = arith.cmpi ne, %16, %c0_i32_7 : i32
    scf.if %17 {
      %c1_i32_58 = arith.constant 1 : i32
      %108 = arith.addi %arg1, %c1_i32_58 : i32
      %c1_i32_59 = arith.constant 1 : i32
      %109 = arith.subi %c1_i32_59, %10 : i32
      %c8_i32_60 = arith.constant 8 : i32
      %110 = arith.muli %108, %c8_i32_60 : i32
      %111 = arith.addi %110, %0 : i32
      %c0_i32_61 = arith.constant 0 : i32
      %112 = arith.addi %111, %c0_i32_61 : i32
      %113 = arith.index_cast %112 : i32 to index
      %114 = memref.load %arg2[%113] : memref<16xi32, #tpu.memory_space<smem>>
      %c0_i32_62 = arith.constant 0 : i32
      %115 = tpu.memref_slice %arg8[%114, %c0_i32_62] : memref<64x128xf32, #tpu.memory_space<any>> -> memref<1x128xf32, #tpu.memory_space<any>>
      %c0_i32_63 = arith.constant 0 : i32
      %116 = tpu.memref_slice %arg10[%109, %c0_i32_61, %c0_i32_63] : memref<2x8x128xf32, #tpu.memory_space<vmem>> -> memref<1x1x128xf32, #tpu.memory_space<vmem>>
      %117 = tpu.memref_squeeze %116 : memref<1x1x128xf32, #tpu.memory_space<vmem>> -> memref<1x128xf32, #tpu.memory_space<vmem>>
      %118 = tpu.memref_slice %arg11[%109] : memref<2x!tpu.dma_semaphore, #tpu.memory_space<semaphore_mem>> -> memref<1x!tpu.dma_semaphore, #tpu.memory_space<semaphore_mem>>
      %119 = tpu.memref_squeeze %118 : memref<1x!tpu.dma_semaphore, #tpu.memory_space<semaphore_mem>> -> memref<!tpu.dma_semaphore, #tpu.memory_space<semaphore_mem>>
      tpu.enqueue_dma source(%115 : memref<1x128xf32, #tpu.memory_space<any>>) target(%117 : memref<1x128xf32, #tpu.memory_space<vmem>>) target_semaphore(%119 : memref<!tpu.dma_semaphore, #tpu.memory_space<semaphore_mem>>)
      %c1_i32_64 = arith.constant 1 : i32
      %120 = arith.addi %111, %c1_i32_64 : i32
      %121 = arith.index_cast %120 : i32 to index
      %122 = memref.load %arg2[%121] : memref<16xi32, #tpu.memory_space<smem>>
      %c0_i32_65 = arith.constant 0 : i32
      %123 = tpu.memref_slice %arg8[%122, %c0_i32_65] : memref<64x128xf32, #tpu.memory_space<any>> -> memref<1x128xf32, #tpu.memory_space<any>>
      %c0_i32_66 = arith.constant 0 : i32
      %124 = tpu.memref_slice %arg10[%109, %c1_i32_64, %c0_i32_66] : memref<2x8x128xf32, #tpu.memory_space<vmem>> -> memref<1x1x128xf32, #tpu.memory_space<vmem>>
      %125 = tpu.memref_squeeze %124 : memref<1x1x128xf32, #tpu.memory_space<vmem>> -> memref<1x128xf32, #tpu.memory_space<vmem>>
      %126 = tpu.memref_slice %arg11[%109] : memref<2x!tpu.dma_semaphore, #tpu.memory_space<semaphore_mem>> -> memref<1x!tpu.dma_semaphore, #tpu.memory_space<semaphore_mem>>
      %127 = tpu.memref_squeeze %126 : memref<1x!tpu.dma_semaphore, #tpu.memory_space<semaphore_mem>> -> memref<!tpu.dma_semaphore, #tpu.memory_space<semaphore_mem>>
      tpu.enqueue_dma source(%123 : memref<1x128xf32, #tpu.memory_space<any>>) target(%125 : memref<1x128xf32, #tpu.memory_space<vmem>>) target_semaphore(%127 : memref<!tpu.dma_semaphore, #tpu.memory_space<semaphore_mem>>)
      %c2_i32_67 = arith.constant 2 : i32
      %128 = arith.addi %111, %c2_i32_67 : i32
      %129 = arith.index_cast %128 : i32 to index
      %130 = memref.load %arg2[%129] : memref<16xi32, #tpu.memory_space<smem>>
      %c0_i32_68 = arith.constant 0 : i32
      %131 = tpu.memref_slice %arg8[%130, %c0_i32_68] : memref<64x128xf32, #tpu.memory_space<any>> -> memref<1x128xf32, #tpu.memory_space<any>>
      %c0_i32_69 = arith.constant 0 : i32
      %132 = tpu.memref_slice %arg10[%109, %c2_i32_67, %c0_i32_69] : memref<2x8x128xf32, #tpu.memory_space<vmem>> -> memref<1x1x128xf32, #tpu.memory_space<vmem>>
      %133 = tpu.memref_squeeze %132 : memref<1x1x128xf32, #tpu.memory_space<vmem>> -> memref<1x128xf32, #tpu.memory_space<vmem>>
      %134 = tpu.memref_slice %arg11[%109] : memref<2x!tpu.dma_semaphore, #tpu.memory_space<semaphore_mem>> -> memref<1x!tpu.dma_semaphore, #tpu.memory_space<semaphore_mem>>
      %135 = tpu.memref_squeeze %134 : memref<1x!tpu.dma_semaphore, #tpu.memory_space<semaphore_mem>> -> memref<!tpu.dma_semaphore, #tpu.memory_space<semaphore_mem>>
      tpu.enqueue_dma source(%131 : memref<1x128xf32, #tpu.memory_space<any>>) target(%133 : memref<1x128xf32, #tpu.memory_space<vmem>>) target_semaphore(%135 : memref<!tpu.dma_semaphore, #tpu.memory_space<semaphore_mem>>)
      %c3_i32_70 = arith.constant 3 : i32
      %136 = arith.addi %111, %c3_i32_70 : i32
      %137 = arith.index_cast %136 : i32 to index
      %138 = memref.load %arg2[%137] : memref<16xi32, #tpu.memory_space<smem>>
      %c0_i32_71 = arith.constant 0 : i32
      %139 = tpu.memref_slice %arg8[%138, %c0_i32_71] : memref<64x128xf32, #tpu.memory_space<any>> -> memref<1x128xf32, #tpu.memory_space<any>>
      %c0_i32_72 = arith.constant 0 : i32
      %140 = tpu.memref_slice %arg10[%109, %c3_i32_70, %c0_i32_72] : memref<2x8x128xf32, #tpu.memory_space<vmem>> -> memref<1x1x128xf32, #tpu.memory_space<vmem>>
      %141 = tpu.memref_squeeze %140 : memref<1x1x128xf32, #tpu.memory_space<vmem>> -> memref<1x128xf32, #tpu.memory_space<vmem>>
      %142 = tpu.memref_slice %arg11[%109] : memref<2x!tpu.dma_semaphore, #tpu.memory_space<semaphore_mem>> -> memref<1x!tpu.dma_semaphore, #tpu.memory_space<semaphore_mem>>
      %143 = tpu.memref_squeeze %142 : memref<1x!tpu.dma_semaphore, #tpu.memory_space<semaphore_mem>> -> memref<!tpu.dma_semaphore, #tpu.memory_space<semaphore_mem>>
      tpu.enqueue_dma source(%139 : memref<1x128xf32, #tpu.memory_space<any>>) target(%141 : memref<1x128xf32, #tpu.memory_space<vmem>>) target_semaphore(%143 : memref<!tpu.dma_semaphore, #tpu.memory_space<semaphore_mem>>)
      %c4_i32_73 = arith.constant 4 : i32
      %144 = arith.addi %111, %c4_i32_73 : i32
      %145 = arith.index_cast %144 : i32 to index
      %146 = memref.load %arg2[%145] : memref<16xi32, #tpu.memory_space<smem>>
      %c0_i32_74 = arith.constant 0 : i32
      %147 = tpu.memref_slice %arg8[%146, %c0_i32_74] : memref<64x128xf32, #tpu.memory_space<any>> -> memref<1x128xf32, #tpu.memory_space<any>>
      %c0_i32_75 = arith.constant 0 : i32
      %148 = tpu.memref_slice %arg10[%109, %c4_i32_73, %c0_i32_75] : memref<2x8x128xf32, #tpu.memory_space<vmem>> -> memref<1x1x128xf32, #tpu.memory_space<vmem>>
      %149 = tpu.memref_squeeze %148 : memref<1x1x128xf32, #tpu.memory_space<vmem>> -> memref<1x128xf32, #tpu.memory_space<vmem>>
      %150 = tpu.memref_slice %arg11[%109] : memref<2x!tpu.dma_semaphore, #tpu.memory_space<semaphore_mem>> -> memref<1x!tpu.dma_semaphore, #tpu.memory_space<semaphore_mem>>
      %151 = tpu.memref_squeeze %150 : memref<1x!tpu.dma_semaphore, #tpu.memory_space<semaphore_mem>> -> memref<!tpu.dma_semaphore, #tpu.memory_space<semaphore_mem>>
      tpu.enqueue_dma source(%147 : memref<1x128xf32, #tpu.memory_space<any>>) target(%149 : memref<1x128xf32, #tpu.memory_space<vmem>>) target_semaphore(%151 : memref<!tpu.dma_semaphore, #tpu.memory_space<semaphore_mem>>)
      %c5_i32_76 = arith.constant 5 : i32
      %152 = arith.addi %111, %c5_i32_76 : i32
      %153 = arith.index_cast %152 : i32 to index
      %154 = memref.load %arg2[%153] : memref<16xi32, #tpu.memory_space<smem>>
      %c0_i32_77 = arith.constant 0 : i32
      %155 = tpu.memref_slice %arg8[%154, %c0_i32_77] : memref<64x128xf32, #tpu.memory_space<any>> -> memref<1x128xf32, #tpu.memory_space<any>>
      %c0_i32_78 = arith.constant 0 : i32
      %156 = tpu.memref_slice %arg10[%109, %c5_i32_76, %c0_i32_78] : memref<2x8x128xf32, #tpu.memory_space<vmem>> -> memref<1x1x128xf32, #tpu.memory_space<vmem>>
      %157 = tpu.memref_squeeze %156 : memref<1x1x128xf32, #tpu.memory_space<vmem>> -> memref<1x128xf32, #tpu.memory_space<vmem>>
      %158 = tpu.memref_slice %arg11[%109] : memref<2x!tpu.dma_semaphore, #tpu.memory_space<semaphore_mem>> -> memref<1x!tpu.dma_semaphore, #tpu.memory_space<semaphore_mem>>
      %159 = tpu.memref_squeeze %158 : memref<1x!tpu.dma_semaphore, #tpu.memory_space<semaphore_mem>> -> memref<!tpu.dma_semaphore, #tpu.memory_space<semaphore_mem>>
      tpu.enqueue_dma source(%155 : memref<1x128xf32, #tpu.memory_space<any>>) target(%157 : memref<1x128xf32, #tpu.memory_space<vmem>>) target_semaphore(%159 : memref<!tpu.dma_semaphore, #tpu.memory_space<semaphore_mem>>)
      %c6_i32_79 = arith.constant 6 : i32
      %160 = arith.addi %111, %c6_i32_79 : i32
      %161 = arith.index_cast %160 : i32 to index
      %162 = memref.load %arg2[%161] : memref<16xi32, #tpu.memory_space<smem>>
      %c0_i32_80 = arith.constant 0 : i32
      %163 = tpu.memref_slice %arg8[%162, %c0_i32_80] : memref<64x128xf32, #tpu.memory_space<any>> -> memref<1x128xf32, #tpu.memory_space<any>>
      %c0_i32_81 = arith.constant 0 : i32
      %164 = tpu.memref_slice %arg10[%109, %c6_i32_79, %c0_i32_81] : memref<2x8x128xf32, #tpu.memory_space<vmem>> -> memref<1x1x128xf32, #tpu.memory_space<vmem>>
      %165 = tpu.memref_squeeze %164 : memref<1x1x128xf32, #tpu.memory_space<vmem>> -> memref<1x128xf32, #tpu.memory_space<vmem>>
      %166 = tpu.memref_slice %arg11[%109] : memref<2x!tpu.dma_semaphore, #tpu.memory_space<semaphore_mem>> -> memref<1x!tpu.dma_semaphore, #tpu.memory_space<semaphore_mem>>
      %167 = tpu.memref_squeeze %166 : memref<1x!tpu.dma_semaphore, #tpu.memory_space<semaphore_mem>> -> memref<!tpu.dma_semaphore, #tpu.memory_space<semaphore_mem>>
      tpu.enqueue_dma source(%163 : memref<1x128xf32, #tpu.memory_space<any>>) target(%165 : memref<1x128xf32, #tpu.memory_space<vmem>>) target_semaphore(%167 : memref<!tpu.dma_semaphore, #tpu.memory_space<semaphore_mem>>)
      %c7_i32_82 = arith.constant 7 : i32
      %168 = arith.addi %111, %c7_i32_82 : i32
      %169 = arith.index_cast %168 : i32 to index
      %170 = memref.load %arg2[%169] : memref<16xi32, #tpu.memory_space<smem>>
      %c0_i32_83 = arith.constant 0 : i32
      %171 = tpu.memref_slice %arg8[%170, %c0_i32_83] : memref<64x128xf32, #tpu.memory_space<any>> -> memref<1x128xf32, #tpu.memory_space<any>>
      %c0_i32_84 = arith.constant 0 : i32
      %172 = tpu.memref_slice %arg10[%109, %c7_i32_82, %c0_i32_84] : memref<2x8x128xf32, #tpu.memory_space<vmem>> -> memref<1x1x128xf32, #tpu.memory_space<vmem>>
      %173 = tpu.memref_squeeze %172 : memref<1x1x128xf32, #tpu.memory_space<vmem>> -> memref<1x128xf32, #tpu.memory_space<vmem>>
      %174 = tpu.memref_slice %arg11[%109] : memref<2x!tpu.dma_semaphore, #tpu.memory_space<semaphore_mem>> -> memref<1x!tpu.dma_semaphore, #tpu.memory_space<semaphore_mem>>
      %175 = tpu.memref_squeeze %174 : memref<1x!tpu.dma_semaphore, #tpu.memory_space<semaphore_mem>> -> memref<!tpu.dma_semaphore, #tpu.memory_space<semaphore_mem>>
      tpu.enqueue_dma source(%171 : memref<1x128xf32, #tpu.memory_space<any>>) target(%173 : memref<1x128xf32, #tpu.memory_space<vmem>>) target_semaphore(%175 : memref<!tpu.dma_semaphore, #tpu.memory_space<semaphore_mem>>)
      %c8_i32_85 = arith.constant 8 : i32
    } else {
    }
    %c0 = arith.constant 0 : index
    %c0_8 = arith.constant 0 : index
    %18 = vector.load %arg4[%c0, %c0_8] : memref<8x128xf32, #tpu.memory_space<vmem>>, vector<8x128xf32>
    %c0_9 = arith.constant 0 : index
    %c0_10 = arith.constant 0 : index
    %c0_11 = arith.constant 0 : index
    %19 = vector.load %arg3[%c0_9, %c0_10, %c0_11] : memref<1x8x1xi32, #tpu.memory_space<vmem>>, vector<1x8x1xi32>
    %20 = vector.shape_cast %19 : vector<1x8x1xi32> to vector<8x1xi32>
    %c0_12 = arith.constant 0 : index
    %c0_13 = arith.constant 0 : index
    %21 = vector.load %arg5[%c0_12, %c0_13] : memref<2x128xf32, #tpu.memory_space<vmem>>, vector<1x128xf32>
    %c0_i32_14 = arith.constant 0 : i32
    %22 = vector.broadcast %c0_i32_14 : i32 to vector<8x1xi32>
    %23 = arith.cmpi eq, %20, %22 : vector<8x1xi32>
    %24 = arith.extui %23 : vector<8x1xi1> to vector<8x1xi32>
    %25 = arith.sitofp %24 : vector<8x1xi32> to vector<8x1xf32>
    %26 = vector.broadcast %25 : vector<8x1xf32> to vector<8x128xf32>
    %27 = vector.broadcast %21 : vector<1x128xf32> to vector<8x128xf32>
    %28 = arith.mulf %26, %27 : vector<8x128xf32>
    %29 = arith.addf %18, %28 : vector<8x128xf32>
    %c1 = arith.constant 1 : index
    %c0_15 = arith.constant 0 : index
    %30 = vector.load %arg5[%c1, %c0_15] : memref<2x128xf32, #tpu.memory_space<vmem>>, vector<1x128xf32>
    %c1_i32_16 = arith.constant 1 : i32
    %31 = vector.broadcast %c1_i32_16 : i32 to vector<8x1xi32>
    %32 = arith.cmpi eq, %20, %31 : vector<8x1xi32>
    %33 = arith.extui %32 : vector<8x1xi1> to vector<8x1xi32>
    %34 = arith.sitofp %33 : vector<8x1xi32> to vector<8x1xf32>
    %35 = vector.broadcast %34 : vector<8x1xf32> to vector<8x128xf32>
    %36 = vector.broadcast %30 : vector<1x128xf32> to vector<8x128xf32>
    %37 = arith.mulf %35, %36 : vector<8x128xf32>
    %38 = arith.addf %29, %37 : vector<8x128xf32>
    %c0_i32_17 = arith.constant 0 : i32
    %c0_i32_18 = arith.constant 0 : i32
    %c0_i32_19 = arith.constant 0 : i32
    %39 = tpu.memref_slice %arg8[%c0_i32_18, %c0_i32_19] : memref<64x128xf32, #tpu.memory_space<any>> -> memref<1x128xf32, #tpu.memory_space<any>>
    %c0_i32_20 = arith.constant 0 : i32
    %40 = tpu.memref_slice %arg10[%10, %c0_i32_17, %c0_i32_20] : memref<2x8x128xf32, #tpu.memory_space<vmem>> -> memref<1x1x128xf32, #tpu.memory_space<vmem>>
    %41 = tpu.memref_squeeze %40 : memref<1x1x128xf32, #tpu.memory_space<vmem>> -> memref<1x128xf32, #tpu.memory_space<vmem>>
    %42 = tpu.memref_slice %arg11[%10] : memref<2x!tpu.dma_semaphore, #tpu.memory_space<semaphore_mem>> -> memref<1x!tpu.dma_semaphore, #tpu.memory_space<semaphore_mem>>
    %43 = tpu.memref_squeeze %42 : memref<1x!tpu.dma_semaphore, #tpu.memory_space<semaphore_mem>> -> memref<!tpu.dma_semaphore, #tpu.memory_space<semaphore_mem>>
    tpu.wait_dma2 semaphore(%43 : memref<!tpu.dma_semaphore, #tpu.memory_space<semaphore_mem>>) src(%39 : memref<1x128xf32, #tpu.memory_space<any>>) dst(%41 : memref<1x128xf32, #tpu.memory_space<vmem>>)
    %c1_i32_21 = arith.constant 1 : i32
    %c0_i32_22 = arith.constant 0 : i32
    %c0_i32_23 = arith.constant 0 : i32
    %44 = tpu.memref_slice %arg8[%c0_i32_22, %c0_i32_23] : memref<64x128xf32, #tpu.memory_space<any>> -> memref<1x128xf32, #tpu.memory_space<any>>
    %c0_i32_24 = arith.constant 0 : i32
    %45 = tpu.memref_slice %arg10[%10, %c1_i32_21, %c0_i32_24] : memref<2x8x128xf32, #tpu.memory_space<vmem>> -> memref<1x1x128xf32, #tpu.memory_space<vmem>>
    %46 = tpu.memref_squeeze %45 : memref<1x1x128xf32, #tpu.memory_space<vmem>> -> memref<1x128xf32, #tpu.memory_space<vmem>>
    %47 = tpu.memref_slice %arg11[%10] : memref<2x!tpu.dma_semaphore, #tpu.memory_space<semaphore_mem>> -> memref<1x!tpu.dma_semaphore, #tpu.memory_space<semaphore_mem>>
    %48 = tpu.memref_squeeze %47 : memref<1x!tpu.dma_semaphore, #tpu.memory_space<semaphore_mem>> -> memref<!tpu.dma_semaphore, #tpu.memory_space<semaphore_mem>>
    tpu.wait_dma2 semaphore(%48 : memref<!tpu.dma_semaphore, #tpu.memory_space<semaphore_mem>>) src(%44 : memref<1x128xf32, #tpu.memory_space<any>>) dst(%46 : memref<1x128xf32, #tpu.memory_space<vmem>>)
    %c2_i32_25 = arith.constant 2 : i32
    %c0_i32_26 = arith.constant 0 : i32
    %c0_i32_27 = arith.constant 0 : i32
    %49 = tpu.memref_slice %arg8[%c0_i32_26, %c0_i32_27] : memref<64x128xf32, #tpu.memory_space<any>> -> memref<1x128xf32, #tpu.memory_space<any>>
    %c0_i32_28 = arith.constant 0 : i32
    %50 = tpu.memref_slice %arg10[%10, %c2_i32_25, %c0_i32_28] : memref<2x8x128xf32, #tpu.memory_space<vmem>> -> memref<1x1x128xf32, #tpu.memory_space<vmem>>
    %51 = tpu.memref_squeeze %50 : memref<1x1x128xf32, #tpu.memory_space<vmem>> -> memref<1x128xf32, #tpu.memory_space<vmem>>
    %52 = tpu.memref_slice %arg11[%10] : memref<2x!tpu.dma_semaphore, #tpu.memory_space<semaphore_mem>> -> memref<1x!tpu.dma_semaphore, #tpu.memory_space<semaphore_mem>>
    %53 = tpu.memref_squeeze %52 : memref<1x!tpu.dma_semaphore, #tpu.memory_space<semaphore_mem>> -> memref<!tpu.dma_semaphore, #tpu.memory_space<semaphore_mem>>
    tpu.wait_dma2 semaphore(%53 : memref<!tpu.dma_semaphore, #tpu.memory_space<semaphore_mem>>) src(%49 : memref<1x128xf32, #tpu.memory_space<any>>) dst(%51 : memref<1x128xf32, #tpu.memory_space<vmem>>)
    %c3_i32 = arith.constant 3 : i32
    %c0_i32_29 = arith.constant 0 : i32
    %c0_i32_30 = arith.constant 0 : i32
    %54 = tpu.memref_slice %arg8[%c0_i32_29, %c0_i32_30] : memref<64x128xf32, #tpu.memory_space<any>> -> memref<1x128xf32, #tpu.memory_space<any>>
    %c0_i32_31 = arith.constant 0 : i32
    %55 = tpu.memref_slice %arg10[%10, %c3_i32, %c0_i32_31] : memref<2x8x128xf32, #tpu.memory_space<vmem>> -> memref<1x1x128xf32, #tpu.memory_space<vmem>>
    %56 = tpu.memref_squeeze %55 : memref<1x1x128xf32, #tpu.memory_space<vmem>> -> memref<1x128xf32, #tpu.memory_space<vmem>>
    %57 = tpu.memref_slice %arg11[%10] : memref<2x!tpu.dma_semaphore, #tpu.memory_space<semaphore_mem>> -> memref<1x!tpu.dma_semaphore, #tpu.memory_space<semaphore_mem>>
    %58 = tpu.memref_squeeze %57 : memref<1x!tpu.dma_semaphore, #tpu.memory_space<semaphore_mem>> -> memref<!tpu.dma_semaphore, #tpu.memory_space<semaphore_mem>>
    tpu.wait_dma2 semaphore(%58 : memref<!tpu.dma_semaphore, #tpu.memory_space<semaphore_mem>>) src(%54 : memref<1x128xf32, #tpu.memory_space<any>>) dst(%56 : memref<1x128xf32, #tpu.memory_space<vmem>>)
    %c4_i32 = arith.constant 4 : i32
    %c0_i32_32 = arith.constant 0 : i32
    %c0_i32_33 = arith.constant 0 : i32
    %59 = tpu.memref_slice %arg8[%c0_i32_32, %c0_i32_33] : memref<64x128xf32, #tpu.memory_space<any>> -> memref<1x128xf32, #tpu.memory_space<any>>
    %c0_i32_34 = arith.constant 0 : i32
    %60 = tpu.memref_slice %arg10[%10, %c4_i32, %c0_i32_34] : memref<2x8x128xf32, #tpu.memory_space<vmem>> -> memref<1x1x128xf32, #tpu.memory_space<vmem>>
    %61 = tpu.memref_squeeze %60 : memref<1x1x128xf32, #tpu.memory_space<vmem>> -> memref<1x128xf32, #tpu.memory_space<vmem>>
    %62 = tpu.memref_slice %arg11[%10] : memref<2x!tpu.dma_semaphore, #tpu.memory_space<semaphore_mem>> -> memref<1x!tpu.dma_semaphore, #tpu.memory_space<semaphore_mem>>
    %63 = tpu.memref_squeeze %62 : memref<1x!tpu.dma_semaphore, #tpu.memory_space<semaphore_mem>> -> memref<!tpu.dma_semaphore, #tpu.memory_space<semaphore_mem>>
    tpu.wait_dma2 semaphore(%63 : memref<!tpu.dma_semaphore, #tpu.memory_space<semaphore_mem>>) src(%59 : memref<1x128xf32, #tpu.memory_space<any>>) dst(%61 : memref<1x128xf32, #tpu.memory_space<vmem>>)
    %c5_i32 = arith.constant 5 : i32
    %c0_i32_35 = arith.constant 0 : i32
    %c0_i32_36 = arith.constant 0 : i32
    %64 = tpu.memref_slice %arg8[%c0_i32_35, %c0_i32_36] : memref<64x128xf32, #tpu.memory_space<any>> -> memref<1x128xf32, #tpu.memory_space<any>>
    %c0_i32_37 = arith.constant 0 : i32
    %65 = tpu.memref_slice %arg10[%10, %c5_i32, %c0_i32_37] : memref<2x8x128xf32, #tpu.memory_space<vmem>> -> memref<1x1x128xf32, #tpu.memory_space<vmem>>
    %66 = tpu.memref_squeeze %65 : memref<1x1x128xf32, #tpu.memory_space<vmem>> -> memref<1x128xf32, #tpu.memory_space<vmem>>
    %67 = tpu.memref_slice %arg11[%10] : memref<2x!tpu.dma_semaphore, #tpu.memory_space<semaphore_mem>> -> memref<1x!tpu.dma_semaphore, #tpu.memory_space<semaphore_mem>>
    %68 = tpu.memref_squeeze %67 : memref<1x!tpu.dma_semaphore, #tpu.memory_space<semaphore_mem>> -> memref<!tpu.dma_semaphore, #tpu.memory_space<semaphore_mem>>
    tpu.wait_dma2 semaphore(%68 : memref<!tpu.dma_semaphore, #tpu.memory_space<semaphore_mem>>) src(%64 : memref<1x128xf32, #tpu.memory_space<any>>) dst(%66 : memref<1x128xf32, #tpu.memory_space<vmem>>)
    %c6_i32 = arith.constant 6 : i32
    %c0_i32_38 = arith.constant 0 : i32
    %c0_i32_39 = arith.constant 0 : i32
    %69 = tpu.memref_slice %arg8[%c0_i32_38, %c0_i32_39] : memref<64x128xf32, #tpu.memory_space<any>> -> memref<1x128xf32, #tpu.memory_space<any>>
    %c0_i32_40 = arith.constant 0 : i32
    %70 = tpu.memref_slice %arg10[%10, %c6_i32, %c0_i32_40] : memref<2x8x128xf32, #tpu.memory_space<vmem>> -> memref<1x1x128xf32, #tpu.memory_space<vmem>>
    %71 = tpu.memref_squeeze %70 : memref<1x1x128xf32, #tpu.memory_space<vmem>> -> memref<1x128xf32, #tpu.memory_space<vmem>>
    %72 = tpu.memref_slice %arg11[%10] : memref<2x!tpu.dma_semaphore, #tpu.memory_space<semaphore_mem>> -> memref<1x!tpu.dma_semaphore, #tpu.memory_space<semaphore_mem>>
    %73 = tpu.memref_squeeze %72 : memref<1x!tpu.dma_semaphore, #tpu.memory_space<semaphore_mem>> -> memref<!tpu.dma_semaphore, #tpu.memory_space<semaphore_mem>>
    tpu.wait_dma2 semaphore(%73 : memref<!tpu.dma_semaphore, #tpu.memory_space<semaphore_mem>>) src(%69 : memref<1x128xf32, #tpu.memory_space<any>>) dst(%71 : memref<1x128xf32, #tpu.memory_space<vmem>>)
    %c7_i32 = arith.constant 7 : i32
    %c0_i32_41 = arith.constant 0 : i32
    %c0_i32_42 = arith.constant 0 : i32
    %74 = tpu.memref_slice %arg8[%c0_i32_41, %c0_i32_42] : memref<64x128xf32, #tpu.memory_space<any>> -> memref<1x128xf32, #tpu.memory_space<any>>
    %c0_i32_43 = arith.constant 0 : i32
    %75 = tpu.memref_slice %arg10[%10, %c7_i32, %c0_i32_43] : memref<2x8x128xf32, #tpu.memory_space<vmem>> -> memref<1x1x128xf32, #tpu.memory_space<vmem>>
    %76 = tpu.memref_squeeze %75 : memref<1x1x128xf32, #tpu.memory_space<vmem>> -> memref<1x128xf32, #tpu.memory_space<vmem>>
    %77 = tpu.memref_slice %arg11[%10] : memref<2x!tpu.dma_semaphore, #tpu.memory_space<semaphore_mem>> -> memref<1x!tpu.dma_semaphore, #tpu.memory_space<semaphore_mem>>
    %78 = tpu.memref_squeeze %77 : memref<1x!tpu.dma_semaphore, #tpu.memory_space<semaphore_mem>> -> memref<!tpu.dma_semaphore, #tpu.memory_space<semaphore_mem>>
    tpu.wait_dma2 semaphore(%78 : memref<!tpu.dma_semaphore, #tpu.memory_space<semaphore_mem>>) src(%74 : memref<1x128xf32, #tpu.memory_space<any>>) dst(%76 : memref<1x128xf32, #tpu.memory_space<vmem>>)
    %c8_i32_44 = arith.constant 8 : i32
    %79 = arith.index_cast %10 : i32 to index
    %c0_45 = arith.constant 0 : index
    %c0_46 = arith.constant 0 : index
    %80 = vector.load %arg10[%79, %c0_45, %c0_46] : memref<2x8x128xf32, #tpu.memory_space<vmem>>, vector<1x8x128xf32>
    %81 = vector.shape_cast %80 : vector<1x8x128xf32> to vector<8x128xf32>
    %82 = arith.addf %38, %81 : vector<8x128xf32>
    %cst = arith.constant dense<0.000000e+00> : vector<8xf32>
    %83 = vector.multi_reduction <add>, %82, %cst [1] : vector<8x128xf32> to vector<8xf32>
    %84 = vector.shape_cast %83 : vector<8xf32> to vector<8x1xf32>
    %cst_47 = arith.constant 7.812500e-03 : f32
    %85 = vector.broadcast %cst_47 : f32 to vector<8x1xf32>
    %86 = arith.mulf %84, %85 : vector<8x1xf32>
    %87 = vector.broadcast %86 : vector<8x1xf32> to vector<8x128xf32>
    %88 = arith.subf %82, %87 : vector<8x128xf32>
    %89 = arith.mulf %88, %88 : vector<8x128xf32>
    %cst_48 = arith.constant dense<0.000000e+00> : vector<8xf32>
    %90 = vector.multi_reduction <add>, %89, %cst_48 [1] : vector<8x128xf32> to vector<8xf32>
    %91 = vector.shape_cast %90 : vector<8xf32> to vector<8x1xf32>
    %cst_49 = arith.constant 7.812500e-03 : f32
    %92 = vector.broadcast %cst_49 : f32 to vector<8x1xf32>
    %93 = arith.mulf %91, %92 : vector<8x1xf32>
    %cst_50 = arith.constant 9.99999996E-13 : f32
    %94 = vector.broadcast %cst_50 : f32 to vector<8x1xf32>
    %95 = arith.addf %93, %94 : vector<8x1xf32>
    %96 = math.rsqrt %95 : vector<8x1xf32>
    %97 = vector.broadcast %96 : vector<8x1xf32> to vector<8x128xf32>
    %98 = arith.mulf %88, %97 : vector<8x128xf32>
    %c0_51 = arith.constant 0 : index
    %c0_52 = arith.constant 0 : index
    %99 = vector.load %arg6[%c0_51, %c0_52] : memref<1x128xf32, #tpu.memory_space<vmem>>, vector<1x128xf32>
    %100 = vector.broadcast %99 : vector<1x128xf32> to vector<8x128xf32>
    %101 = arith.mulf %98, %100 : vector<8x128xf32>
    %c0_53 = arith.constant 0 : index
    %c0_54 = arith.constant 0 : index
    %102 = vector.load %arg7[%c0_53, %c0_54] : memref<1x128xf32, #tpu.memory_space<vmem>>, vector<1x128xf32>
    %103 = vector.broadcast %102 : vector<1x128xf32> to vector<8x128xf32>
    %104 = arith.addf %101, %103 : vector<8x128xf32>
    %c0_55 = arith.constant 0 : index
    %c0_56 = arith.constant 0 : index
    %c0_57 = arith.constant 0 : index
    %105 = vector.load %arg9[%c0_55, %c0_56, %c0_57] : memref<1x8x128xf32, #tpu.memory_space<vmem>>, vector<1x8x128xf32>
    %106 = vector.shape_cast %105 : vector<1x8x128xf32> to vector<8x128xf32>
    %107 = vector.shape_cast %104 : vector<8x128xf32> to vector<1x8x128xf32>
    tpu.vector_store %arg9[%c0_55, %c0_56, %c0_57], %107 {strides = array<i32>} : memref<1x8x128xf32, #tpu.memory_space<vmem>>, vector<1x8x128xf32>,
    return
  }
  func.func @transform_0(%arg0: i32, %arg1: i32, %arg2: memref<16xi32, #tpu.memory_space<smem>>) -> (i32, i32, i32) {
    %c0_i32 = arith.constant 0 : i32
    %c0_i32_0 = arith.constant 0 : i32
    return %arg1, %arg0, %c0_i32 : i32, i32, i32
  }
  func.func @transform_1(%arg0: i32, %arg1: i32, %arg2: memref<16xi32, #tpu.memory_space<smem>>) -> (i32, i32) {
    %c0_i32 = arith.constant 0 : i32
    %c0_i32_0 = arith.constant 0 : i32
    return %arg0, %c0_i32 : i32, i32
  }
  func.func @transform_2(%arg0: i32, %arg1: i32, %arg2: memref<16xi32, #tpu.memory_space<smem>>) -> (i32, i32) {
    %c0_i32 = arith.constant 0 : i32
    %c0_i32_0 = arith.constant 0 : i32
    %c0_i32_1 = arith.constant 0 : i32
    return %c0_i32, %c0_i32_0 : i32, i32
  }
  func.func @transform_3(%arg0: i32, %arg1: i32, %arg2: memref<16xi32, #tpu.memory_space<smem>>) -> (i32, i32) {
    %c0_i32 = arith.constant 0 : i32
    %c0_i32_0 = arith.constant 0 : i32
    %c0_i32_1 = arith.constant 0 : i32
    return %c0_i32, %c0_i32_0 : i32, i32
  }
  func.func @transform_4(%arg0: i32, %arg1: i32, %arg2: memref<16xi32, #tpu.memory_space<smem>>) -> (i32, i32) {
    %c0_i32 = arith.constant 0 : i32
    %c0_i32_0 = arith.constant 0 : i32
    %c0_i32_1 = arith.constant 0 : i32
    return %c0_i32, %c0_i32_0 : i32, i32
  }
  func.func @transform_6(%arg0: i32, %arg1: i32, %arg2: memref<16xi32, #tpu.memory_space<smem>>) -> (i32, i32, i32) {
    %c0_i32 = arith.constant 0 : i32
    %c0_i32_0 = arith.constant 0 : i32
    return %arg1, %arg0, %c0_i32 : i32, i32, i32
  }
}

</mosaic_0001>

<bundles_post_ra>
// kernel: tpu_custom_call.1
= control target key start
LH: loop header
LB: loop body
LE: loop exit
PB: predicated region body
PF: predicated region fallthrough
CT: control target
= control target key end

     0   :  { %s1557_s27 = smov [#allocation5]   ;;  %s2238_s0 = inlined_call_operand.vmem [shape: s32[16], index: 0, kind: input, shape index: {}]   ;;  %s2239_s1 = inlined_call_operand.vmem [shape: s32[2,8,1], index: 1, kind: input, shape index: {}]   ;;  %s2240_s2 = inlined_call_operand.vmem [shape: f32[16,128], index: 2, kind: input, shape index: {}]   ;;  %s2241_s3 = inlined_call_operand.vmem [shape: f32[2,128], index: 3, kind: input, shape index: {}]   ;;  %s2242_s4 = inlined_call_operand.vmem [shape: f32[1,128], index: 4, kind: input, shape index: {}]   ;;  %s2243_s5 = inlined_call_operand.vmem [shape: f32[1,128], index: 5, kind: input, shape index: {}]   ;;  %s2244_s6 = inlined_call_operand.hbm [shape: f32[64,128], index: 6, kind: input, shape index: {}]   ;;  %s2245_s7 = inlined_call_operand.hbm [shape: f32[2,8,128], index: 7, kind: output, shape index: {}]  }
   0x1   :  { %2261 = sst [smem:[#allocation70_spill]] %s2239_s1  ;;  %s13_s26 = sshll.u32 %s2238_s0, 4  ;;  %s14_s26 = int_to_ptr.vmem [resolvable:$true] %s13_s26 }
   0x2   :  { %2262 = sst [smem:[#allocation71_spill]] %s2242_s4 }
   0x3   :  { %2263 = sst [smem:[#allocation72_spill]] %s2243_s5 }
   0x4   :  { %2264 = sst [smem:[#allocation73_spill]] %s2245_s7 }
   0x5   :  { %16 = dma.vmem_to_smem %s14_s26, 16, %s1557_s27, [#allocation4] }
   0x6   :  { %1525 = dma.done.wait [#allocation4], 16 }
   0x7   :  { %1526 = vsyncadd [#allocation4], 4294967280 }
   0x8   :  { %19 = sfence }
   0x9   :  { %20 = vsyncpa [#allocation7], 0 }
   0xa   :  { %22 = vsyncpa [#allocation7 + $0x1], 0  ;;  %s1604_s28 = smov 0   ;;  %s1606_s29 = smov 0  }
   0xb   :  { %s1608_s30 = smov 0   ;;  %s1610_s8 = smov 0  }
   0xc   :  { %s1612_s9 = smov 0   ;;  %s1614_s10 = smov 0  }
   0xd LB: > { %2265 = sst [smem:[#allocation61_spill]] %s1535_s28  ;;  %s849_s0 = sadd.s32 4294967295, %s1555_s10   ;;  %s1555_s10 = sphi %s1614_s10, %s28_s10   ;;  %s1551_s9 = sphi %s1612_s9, %s2297_s9   ;;  %s1547_s8 = sphi %s1610_s8, %s2296_s8   ;;  %s1543_s30 = sphi %s1608_s30, %s2295_s30   ;;  %s1539_s29 = sphi %s1606_s29, %s2299_s29   ;;  %s1535_s28 = sphi %s1604_s28, %s2298_s28  }
   0xe   : > { %2266 = sst [smem:[#allocation62_spill]] %s1543_s30  ;;  %s850_s11 = sadd.s32 4294967294, %s1555_s10  }
   0xf   : > { %2267 = sst [smem:[#allocation63_spill]] %s1551_s9  ;;  %s37_s12 = sadd.s32 1, %s1551_s9 }
  0x10   : > { %2268 = sst [smem:[#allocation64_spill]] %s1555_s10  ;;  %s166_s13 = sadd.s32 1, %s1543_s30 }
  0x11   : > { %p38_p0 = scmp.ge.s32.totalorder %s37_s12, 2  ;;  %p176_p1 = scmp.ne.s32.totalorder %s1543_s30, %s1539_s29 }
  0x12   : > { %p177_p2 = scmp.eq.s32.totalorder %s849_s0, 1  ;;  %p182_p3 = scmp.ne.s32.totalorder %s1539_s29, %s1535_s28 }
  0x13   : > { %s2301_s12 = smov (%p38_p0, %s37_s12), 0  ;;  %p183_p5 = scmp.eq.s32.totalorder %s850_s11, 1 }
  0x14   : > { %2269 = sst [smem:[#allocation65_spill]] %s2301_s12  ;;  %p1644_p4 = por %p177_p2, %p176_p1 }
  0x15   : > { %s161_s15 = ssub.s32 %s1551_s9, %s2301_s12  ;;  %p854_p6 = scmp.ge.s32.totalorder %s1555_s10, 1 }
  0x16   : > { %s2270_s14 = scalar_select %p1644_p4, 1, 0 }
  0x17   : > { %p164_p7 = scmp.eq.s32.totalorder %s161_s15, 0  ;;  %p1651_p8 = por %p183_p5, %p182_p3 }
  0x18   : > { %2271 = sst [smem:[#allocation66_spill]] %s2270_s14  ;;  %p227_p9 = scmp.lt.s32.totalorder %s1555_s10, 3 }
  0x19   : > { %s2272_s16 = scalar_select %p1651_p8, 1, 0 }
  0x1a   : > { %s1657_s17 = scalar_select %p164_p7, %s1543_s30, %s166_s13  }
  0x1b   : > { %2273 = sst [smem:[#allocation67_spill]] %s2272_s16  ;;  %p228_p10 = pnand %p854_p6, %p227_p9 }
  0x1c   : > { %2274 = sst [smem:[#allocation68_spill]] %s1657_s17 }
  0x1d   : > { %231 = sbr.rel (%p228_p10) target bundleno = 776 (0x308), region = 40 }
  0x22   : > { %p261_p11 = scmp.lt.s32.totalorder %s1547_s8, 1  ;;  %s2246_s18 = sand.u32 1, %s1539_s29   ;;  %v1558_v0 = vmov 0   ;;  %v1559_v2 = vmov 0.0  }
  0x23   : > { %1001 = vset.pattern.permute.xlu0 %v1558_v0  ;;  %s1663_s19 = sshll.u32 %s2246_s18, 3  ;;  %p273_p12 = scmp.lt.s32.totalorder %s1547_s8, 0 }
  0x24   : > { %s262_s20 = scalar_select %p261_p11, %s1547_s8, 1 }
  0x25   : > { %s274_s21 = ssub.s32 0, %s1547_s8  ;;  %s2275_s1 = sld [smem:[#allocation70_spill]] }
  0x26   : > { %s856_s22 = sshll.u32 %s262_s20, 3  ;;  %s857_s23 = smin.u32 %s1547_s8, %s274_s21 }
  0x27   : > { %s276_s27 = sand.u32 1, %s857_s23   ;;  %p947_p13 = scmp.eq.s32.totalorder %s1547_s8, 0 }
  0x28   : > { %s277_s0 = ssub.s32 0, %s276_s27  ;;  %s1674_s11 = sshll.u32 %s1547_s8, 3 }
  0x29   : > { %s2303_s0 = smov (!%p273_p12, %s277_s0), %s276_s27  ;;  %s309_s23 = sadd.s32 1, %s1674_s11 }
  0x2a   : > { %p859_p0 = scmp.lt.s32.totalorder %s2303_s0, 0  ;;  %s283_s13 = sadd.s32 2, %s2303_s0 }
  0x2b   : > { %s267_s26 = scalar_lea.vmem %s2275_s1, %s856_s22  ;;  %s2307_s23 = smov (!%p947_p13, %s309_s23), 0 }
  0x2c   : > { %v588_v1 = vld [vmem:[%s267_s26] sm:$0xff]  ;;  %s892_s15 = scalar_select %p947_p13, [#allocation5], [#allocation42] }
  0x2d   : > { %vm590_vm0 = vcmp.eq.s32.totalorder %v588_v1, 0  ;;  %vm602_vm1 = vcmp.eq.s32.totalorder %v588_v1, 1  ;;  %s2305_s13 = smov (!%p859_p0, %s283_s13), %s2303_s0  ;;  %s327_s12 = sadd.s32 2, %s1674_s11 }
  0x2e   : > { %v880_v3 = vsel %vm590_vm0, 1.0, %v1559_v2  ;;  %v881_v4 = vsel %vm602_vm1, 1.0, %v1559_v2  ;;  %s893_s20 = scalar_select %p947_p13, %s1674_s11, 0 }
  0x2f   : > { %v1002_v5 = vpack.i.bf16 %v881_v4, %v880_v3  ;;  %s862_s21 = sshll.u32 %s2305_s13, 3  ;;  %s1708_s17 = scalar_lea.sflag [#allocation3], %s2305_s13 }
  0x30   : > { %s291_s22 = sld [smem:[%s892_s15 + %s893_s20]]  ;;  %s1685_s24 = scalar_lea.vmem [#allocation2], %s862_s21 }
  0x31   : > { %1003 = vperm.xlu0 %1001, %v1002_v5   ;;  %s305_s25 = sshll.u32 %s1685_s24, 4  ;;  %s742_s26 = scalar_lea.vmem %s1685_s24, 1 [#allocation2]  ;;  %s1693_s25 = int_to_ptr.vmem [resolvable:$true] %s305_s25 }
  0x32   : > { %s895_s27 = scalar_select %p947_p13, [#allocation5], [#allocation43] }
  0x33   : > { %s1695_s0 = sshll.u32 %s742_s26, 4  ;;  %s324_s0 = int_to_ptr.vmem [resolvable:$true] %s1695_s0 }
  0x34   : > { %s1700_s20 = sld [smem:[%s895_s27 + %s2307_s23]] }
  0x36   : > { %s292_s15 = scalar_lea.hbm %s2244_s6, %s291_s22  ;;  %s1717_s22 = scalar_lea.hbm %s2244_s6, 64 }
  0x37   : > { %s1702_s21 = sshll.u32 %s292_s15, 4  ;;  %s304_s21 = int_to_ptr.hbm [resolvable:$true] %s1702_s21 }
  0x38   : > { %s1025_s30 = sshra.s32 %s304_s21, 4  ;;  %s1026_s30 = int_to_ptr.hbm [resolvable:$true] %s1025_s30 }
  0x39   : > { %s1027_s26 = scalar_lea.hbm %s1026_s30, 1  ;;  %p1032_p5 = scmp.lt.s32.totalorder %s1026_s30, %s2244_s6 }
  0x3a   : > { %p1028_p1 = scmp.ne.s32.totalorder %s1026_s30, %s1027_s26  ;;  %p1033_p6 = scmp.lt.s32.totalorder %s1717_s22, %s1027_s26 }
  0x3c   : > { %p1029_p2 = pnand %p1028_p1, %p947_p13  ;;  %p1034_p7 = por %p1033_p6, %p1032_p5 }
  0x3e   : > { %p1030_p3 = pneg %p1029_p2 }
  0x40   : > { %p1035_p9 = pnand %p1034_p7, %p1030_p3 }
  0x42   : > { %1038 = shalt.err (!%p1035_p9)  }
  0x43   : > { %s1039_s15 = sshra.s32 %s1693_s25, 4  ;;  %s1560_s1 = smov [#allocation2]   ;;  %s1040_s15 = int_to_ptr.vmem [resolvable:$true] %s1039_s15 }
  0x44   : > { %s1041_s9 = scalar_lea.vmem %s1040_s15, 1  ;;  %s1726_s18 = scalar_lea.vmem %s1560_s1, 16 }
  0x45   : > { %p1042_p10 = scmp.ne.s32.totalorder %s1040_s15, %s1041_s9  ;;  %p1046_p0 = scmp.lt.s32.totalorder %s1040_s15, [#allocation2] }
  0x46   : > { %p1047_p1 = scmp.lt.s32.totalorder %s1726_s18, %s1041_s9 }
  0x47   : > { %p1043_p11 = pnand %p1042_p10, %p947_p13 }
  0x48   : > { %p1048_p2 = por %p1047_p1, %p1046_p0 }
  0x49   : > { %p1044_p12 = pneg %p1043_p11 }
  0x4b   : > { %p1049_p8 = pnand %p1048_p2, %p1044_p12 }
  0x4d   : > { %1052 = shalt.err (!%p1049_p8)  }
  0x4e   : > { %894 = dma.hbm_to_vmem [thread:$0]  (%p947_p13), %s304_s21, 16, %s1693_s25, %s1708_s17 }
  0x4f   : > { %s898_s30 = scalar_select %p947_p13, [#allocation5], [#allocation44] }
  0x50   : > { %s2309_s12 = smov (!%p947_p13, %s327_s12), 0  ;;  %s311_s23 = scalar_lea.hbm %s2244_s6, %s1700_s20 }
  0x51   : > { %s321_s27 = sshll.u32 %s311_s23, 4  ;;  %s1746_s15 = sld [smem:[%s898_s30 + %s2309_s12]]  ;;  %s322_s27 = int_to_ptr.hbm [resolvable:$true] %s321_s27 }
  0x52   : > { %s2276_s1 = scalar_lea.vmem %s1685_s24, 2 [#allocation2]  ;;  %s1053_s28 = sshra.s32 %s322_s27, 4  ;;  %s1054_s28 = int_to_ptr.hbm [resolvable:$true] %s1053_s28 }
  0x53   : > { %s1750_s16 = sshll.u32 %s2276_s1, 4  ;;  %s1055_s25 = scalar_lea.hbm %s1054_s28, 1  ;;  %s342_s16 = int_to_ptr.vmem [resolvable:$true] %s1750_s16 }
  0x54   : > { %p1056_p8 = scmp.ne.s32.totalorder %s1054_s28, %s1055_s25  ;;  %p1060_p6 = scmp.lt.s32.totalorder %s1054_s28, %s2244_s6 }
  0x55   : > { %p1061_p7 = scmp.lt.s32.totalorder %s1717_s22, %s1055_s25 }
  0x56   : > { %p1057_p3 = pnand %p1056_p8, %p947_p13 }
  0x57   : > { %p1062_p9 = por %p1061_p7, %p1060_p6 }
  0x58   : > { %p1058_p5 = pneg %p1057_p3 }
  0x5a   : > { %p1063_p10 = pnand %p1062_p9, %p1058_p5 }
  0x5c   : > { %1066 = shalt.err (!%p1063_p10)  }
  0x5d   : > { %s1067_s12 = sshra.s32 %s324_s0, 4  ;;  %s1068_s12 = int_to_ptr.vmem [resolvable:$true] %s1067_s12 }
  0x5e   : > { %s1069_s20 = scalar_lea.vmem %s1068_s12, 1  ;;  %p1074_p1 = scmp.lt.s32.totalorder %s1068_s12, [#allocation2] }
  0x5f   : > { %p1070_p11 = scmp.ne.s32.totalorder %s1068_s12, %s1069_s20  ;;  %p1075_p2 = scmp.lt.s32.totalorder %s1726_s18, %s1069_s20 }
  0x61   : > { %p1071_p12 = pnand %p1070_p11, %p947_p13  ;;  %p1076_p8 = por %p1075_p2, %p1074_p1 }
  0x63   : > { %p1072_p0 = pneg %p1071_p12 }
  0x65   : > { %p1077_p3 = pnand %p1076_p8, %p1072_p0 }
  0x67   : > { %1080 = shalt.err (!%p1077_p3)  }
  0x68   : > { %897 = dma.hbm_to_vmem [thread:$0]  (%p947_p13), %s322_s27, 16, %s324_s0, %s1708_s17 }
  0x69   : > { %s345_s28 = sadd.s32 3, %s1674_s11  ;;  %s750_s10 = scalar_lea.vmem %s1685_s24, 3 [#allocation2] }
  0x6a   : > { %s901_s30 = scalar_select %p947_p13, [#allocation5], [#allocation45] }
  0x6b   : > { %s2311_s28 = smov (!%p947_p13, %s345_s28), 0  ;;  %s329_s23 = scalar_lea.hbm %s2244_s6, %s1746_s15 }
  0x6c   : > { %s339_s1 = sshll.u32 %s329_s23, 4  ;;  %s1775_s25 = sld [smem:[%s901_s30 + %s2311_s28]]  ;;  %s340_s1 = int_to_ptr.hbm [resolvable:$true] %s339_s1 }
  0x6d   : > { %s1777_s21 = sshll.u32 %s750_s10, 4  ;;  %s1081_s12 = sshra.s32 %s340_s1, 4  ;;  %s1082_s12 = int_to_ptr.hbm [resolvable:$true] %s1081_s12  ;;  %s360_s21 = int_to_ptr.vmem [resolvable:$true] %s1777_s21 }
  0x6e   : > { %s1083_s0 = scalar_lea.hbm %s1082_s12, 1  ;;  %p1088_p9 = scmp.lt.s32.totalorder %s1082_s12, %s2244_s6 }
  0x6f   : > { %p1084_p5 = scmp.ne.s32.totalorder %s1082_s12, %s1083_s0  ;;  %p1089_p10 = scmp.lt.s32.totalorder %s1717_s22, %s1083_s0 }
  0x71   : > { %p1085_p6 = pnand %p1084_p5, %p947_p13  ;;  %p1090_p11 = por %p1089_p10, %p1088_p9 }
  0x73   : > { %p1086_p7 = pneg %p1085_p6 }
  0x75   : > { %p1091_p12 = pnand %p1090_p11, %p1086_p7 }
  0x77   : > { %1094 = shalt.err (!%p1091_p12)  }
  0x78   : > { %s1095_s15 = sshra.s32 %s342_s16, 4  ;;  %s1096_s15 = int_to_ptr.vmem [resolvable:$true] %s1095_s15 }
  0x79   : > { %s1097_s28 = scalar_lea.vmem %s1096_s15, 1  ;;  %p1102_p8 = scmp.lt.s32.totalorder %s1096_s15, [#allocation2] }
  0x7a   : > { %p1098_p0 = scmp.ne.s32.totalorder %s1096_s15, %s1097_s28  ;;  %p1103_p3 = scmp.lt.s32.totalorder %s1726_s18, %s1097_s28 }
  0x7c   : > { %p1099_p1 = pnand %p1098_p0, %p947_p13  ;;  %p1104_p5 = por %p1103_p3, %p1102_p8 }
  0x7e   : > { %p1100_p2 = pneg %p1099_p1 }
  0x80   : > { %p1105_p6 = pnand %p1104_p5, %p1100_p2 }
  0x82   : > { %1108 = shalt.err (!%p1105_p6)  }
  0x83   : > { %900 = dma.hbm_to_vmem [thread:$0]  (%p947_p13), %s340_s1, 16, %s342_s16, %s1708_s17 }
  0x84   : > { %s363_s10 = sadd.s32 4, %s1674_s11  ;;  %s754_s30 = scalar_lea.vmem %s1685_s24, 4 [#allocation2] }
  0x85   : > { %s904_s9 = scalar_select %p947_p13, [#allocation5], [#allocation46] }
  0x86   : > { %s2313_s10 = smov (!%p947_p13, %s363_s10), 0  ;;  %s347_s12 = scalar_lea.hbm %s2244_s6, %s1775_s25 }
  0x87   : > { %s357_s0 = sshll.u32 %s347_s12, 4  ;;  %s1802_s27 = sld [smem:[%s904_s9 + %s2313_s10]]  ;;  %s358_s0 = int_to_ptr.hbm [resolvable:$true] %s357_s0 }
  0x88   : > { %s1804_s20 = sshll.u32 %s754_s30, 4  ;;  %s1109_s15 = sshra.s32 %s358_s0, 4  ;;  %s1110_s15 = int_to_ptr.hbm [resolvable:$true] %s1109_s15  ;;  %s378_s20 = int_to_ptr.vmem [resolvable:$true] %s1804_s20 }
  0x89   : > { %s1111_s16 = scalar_lea.hbm %s1110_s15, 1  ;;  %p1116_p11 = scmp.lt.s32.totalorder %s1110_s15, %s2244_s6 }
  0x8a   : > { %p1112_p7 = scmp.ne.s32.totalorder %s1110_s15, %s1111_s16  ;;  %p1117_p12 = scmp.lt.s32.totalorder %s1717_s22, %s1111_s16 }
  0x8c   : > { %p1113_p9 = pnand %p1112_p7, %p947_p13  ;;  %p1118_p0 = por %p1117_p12, %p1116_p11 }
  0x8e   : > { %p1114_p10 = pneg %p1113_p9 }
  0x90   : > { %p1119_p1 = pnand %p1118_p0, %p1114_p10 }
  0x92   : > { %1122 = shalt.err (!%p1119_p1)  }
  0x93   : > { %s1123_s25 = sshra.s32 %s360_s21, 4  ;;  %s1124_s25 = int_to_ptr.vmem [resolvable:$true] %s1123_s25 }
  0x94   : > { %s1125_s10 = scalar_lea.vmem %s1124_s25, 1  ;;  %p1130_p5 = scmp.lt.s32.totalorder %s1124_s25, [#allocation2] }
  0x95   : > { %p1126_p2 = scmp.ne.s32.totalorder %s1124_s25, %s1125_s10  ;;  %p1131_p6 = scmp.lt.s32.totalorder %s1726_s18, %s1125_s10 }
  0x97   : > { %p1127_p8 = pnand %p1126_p2, %p947_p13  ;;  %p1132_p7 = por %p1131_p6, %p1130_p5 }
  0x99   : > { %p1128_p3 = pneg %p1127_p8 }
  0x9b   : > { %p1133_p9 = pnand %p1132_p7, %p1128_p3 }
  0x9d   : > { %1136 = shalt.err (!%p1133_p9)  }
  0x9e   : > { %903 = dma.hbm_to_vmem [thread:$0]  (%p947_p13), %s358_s0, 16, %s360_s21, %s1708_s17 }
  0x9f   : > { %s381_s30 = sadd.s32 5, %s1674_s11  ;;  %s758_s9 = scalar_lea.vmem %s1685_s24, 5 [#allocation2] }
  0xa0   : > { %s907_s26 = scalar_select %p947_p13, [#allocation5], [#allocation47] }
  0xa1   : > { %s2315_s30 = smov (!%p947_p13, %s381_s30), 0  ;;  %s365_s15 = scalar_lea.hbm %s2244_s6, %s1802_s27 }
  0xa2   : > { %s375_s16 = sshll.u32 %s365_s15, 4  ;;  %s1829_s1 = sld [smem:[%s907_s26 + %s2315_s30]]  ;;  %s376_s16 = int_to_ptr.hbm [resolvable:$true] %s375_s16 }
  0xa3   : > { %s1831_s28 = sshll.u32 %s758_s9, 4  ;;  %s1137_s25 = sshra.s32 %s376_s16, 4  ;;  %s1138_s25 = int_to_ptr.hbm [resolvable:$true] %s1137_s25  ;;  %s396_s28 = int_to_ptr.vmem [resolvable:$true] %s1831_s28 }
  0xa4   : > { %s1139_s21 = scalar_lea.hbm %s1138_s25, 1  ;;  %p1144_p0 = scmp.lt.s32.totalorder %s1138_s25, %s2244_s6 }
  0xa5   : > { %p1140_p10 = scmp.ne.s32.totalorder %s1138_s25, %s1139_s21  ;;  %p1145_p1 = scmp.lt.s32.totalorder %s1717_s22, %s1139_s21 }
  0xa7   : > { %p1141_p11 = pnand %p1140_p10, %p947_p13  ;;  %p1146_p2 = por %p1145_p1, %p1144_p0 }
  0xa9   : > { %p1142_p12 = pneg %p1141_p11 }
  0xab   : > { %p1147_p8 = pnand %p1146_p2, %p1142_p12 }
  0xad   : > { %1150 = shalt.err (!%p1147_p8)  }
  0xae   : > { %s1151_s27 = sshra.s32 %s378_s20, 4  ;;  %s1152_s27 = int_to_ptr.vmem [resolvable:$true] %s1151_s27 }
  0xaf   : > { %s1153_s30 = scalar_lea.vmem %s1152_s27, 1  ;;  %p1158_p7 = scmp.lt.s32.totalorder %s1152_s27, [#allocation2] }
  0xb0   : > { %p1154_p3 = scmp.ne.s32.totalorder %s1152_s27, %s1153_s30  ;;  %p1159_p9 = scmp.lt.s32.totalorder %s1726_s18, %s1153_s30 }
  0xb2   : > { %p1155_p5 = pnand %p1154_p3, %p947_p13  ;;  %p1160_p10 = por %p1159_p9, %p1158_p7 }
  0xb4   : > { %p1156_p6 = pneg %p1155_p5 }
  0xb6   : > { %p1161_p11 = pnand %p1160_p10, %p1156_p6 }
  0xb8   : > { %1164 = shalt.err (!%p1161_p11)  }
  0xb9   : > { %906 = dma.hbm_to_vmem [thread:$0]  (%p947_p13), %s376_s16, 16, %s378_s20, %s1708_s17 }
  0xba   : > { %s399_s9 = sadd.s32 6, %s1674_s11  ;;  %s762_s26 = scalar_lea.vmem %s1685_s24, 6 [#allocation2] }
  0xbb   : > { %s910_s23 = scalar_select %p947_p13, [#allocation5], [#allocation48] }
  0xbc   : > { %s2317_s9 = smov (!%p947_p13, %s399_s9), 0  ;;  %s383_s25 = scalar_lea.hbm %s2244_s6, %s1829_s1 }
  0xbd   : > { %s393_s21 = sshll.u32 %s383_s25, 4  ;;  %s1856_s0 = sld [smem:[%s910_s23 + %s2317_s9]]  ;;  %s394_s21 = int_to_ptr.hbm [resolvable:$true] %s393_s21 }
  0xbe   : > { %s1858_s10 = sshll.u32 %s762_s26, 4  ;;  %s1165_s27 = sshra.s32 %s394_s21, 4  ;;  %s1166_s27 = int_to_ptr.hbm [resolvable:$true] %s1165_s27  ;;  %s414_s10 = int_to_ptr.vmem [resolvable:$true] %s1858_s10 }
  0xbf   : > { %s1167_s20 = scalar_lea.hbm %s1166_s27, 1  ;;  %p1172_p2 = scmp.lt.s32.totalorder %s1166_s27, %s2244_s6 }
  0xc0   : > { %p1168_p12 = scmp.ne.s32.totalorder %s1166_s27, %s1167_s20  ;;  %p1173_p8 = scmp.lt.s32.totalorder %s1717_s22, %s1167_s20 }
  0xc2   : > { %p1169_p0 = pnand %p1168_p12, %p947_p13  ;;  %p1174_p3 = por %p1173_p8, %p1172_p2 }
  0xc4   : > { %p1170_p1 = pneg %p1169_p0 }
  0xc6   : > { %p1175_p5 = pnand %p1174_p3, %p1170_p1 }
  0xc8   : > { %1178 = shalt.err (!%p1175_p5)  }
  0xc9   : > { %s1179_s1 = sshra.s32 %s396_s28, 4  ;;  %s1180_s1 = int_to_ptr.vmem [resolvable:$true] %s1179_s1 }
  0xca   : > { %s1181_s9 = scalar_lea.vmem %s1180_s1, 1  ;;  %p1186_p10 = scmp.lt.s32.totalorder %s1180_s1, [#allocation2] }
  0xcb   : > { %p1182_p6 = scmp.ne.s32.totalorder %s1180_s1, %s1181_s9  ;;  %p1187_p11 = scmp.lt.s32.totalorder %s1726_s18, %s1181_s9 }
  0xcd   : > { %p1183_p7 = pnand %p1182_p6, %p947_p13  ;;  %p1188_p12 = por %p1187_p11, %p1186_p10 }
  0xcf   : > { %p1184_p9 = pneg %p1183_p7 }
  0xd1   : > { %p1189_p0 = pnand %p1188_p12, %p1184_p9 }
  0xd3   : > { %1192 = shalt.err (!%p1189_p0)  }
  0xd4   : > { %909 = dma.hbm_to_vmem [thread:$0]  (%p947_p13), %s394_s21, 16, %s396_s28, %s1708_s17 }
  0xd5   : > { %s417_s26 = sadd.s32 7, %s1674_s11  ;;  %s766_s23 = scalar_lea.vmem %s1685_s24, 7 [#allocation2] }
  0xd6   : > { %s913_s12 = scalar_select %p947_p13, [#allocation5], [#allocation49] }
  0xd7   : > { %s2319_s26 = smov (!%p947_p13, %s417_s26), 0  ;;  %s401_s27 = scalar_lea.hbm %s2244_s6, %s1856_s0 }
  0xd8   : > { %s411_s20 = sshll.u32 %s401_s27, 4  ;;  %s1883_s16 = sld [smem:[%s913_s12 + %s2319_s26]]  ;;  %s412_s20 = int_to_ptr.hbm [resolvable:$true] %s411_s20 }
  0xd9   : > { %s1885_s30 = sshll.u32 %s766_s23, 4  ;;  %s1193_s1 = sshra.s32 %s412_s20, 4  ;;  %s1194_s1 = int_to_ptr.hbm [resolvable:$true] %s1193_s1  ;;  %s432_s30 = int_to_ptr.vmem [resolvable:$true] %s1885_s30 }
  0xda   : > { %s1195_s28 = scalar_lea.hbm %s1194_s1, 1  ;;  %p1200_p3 = scmp.lt.s32.totalorder %s1194_s1, %s2244_s6 }
  0xdb   : > { %p1196_p1 = scmp.ne.s32.totalorder %s1194_s1, %s1195_s28  ;;  %p1201_p5 = scmp.lt.s32.totalorder %s1717_s22, %s1195_s28 }
  0xdd   : > { %p1197_p2 = pnand %p1196_p1, %p947_p13  ;;  %p1202_p6 = por %p1201_p5, %p1200_p3 }
  0xdf   : > { %p1198_p8 = pneg %p1197_p2 }
  0xe1   : > { %p1203_p7 = pnand %p1202_p6, %p1198_p8 }
  0xe3   : > { %1206 = shalt.err (!%p1203_p7)  }
  0xe4   : > { %s1207_s0 = sshra.s32 %s414_s10, 4  ;;  %s1208_s0 = int_to_ptr.vmem [resolvable:$true] %s1207_s0 }
  0xe5   : > { %s1209_s26 = scalar_lea.vmem %s1208_s0, 1  ;;  %p1214_p12 = scmp.lt.s32.totalorder %s1208_s0, [#allocation2] }
  0xe6   : > { %p1210_p9 = scmp.ne.s32.totalorder %s1208_s0, %s1209_s26  ;;  %p1215_p0 = scmp.lt.s32.totalorder %s1726_s18, %s1209_s26 }
  0xe8   : > { %p1211_p10 = pnand %p1210_p9, %p947_p13  ;;  %p1216_p1 = por %p1215_p0, %p1214_p12 }
  0xea   : > { %p1212_p11 = pneg %p1211_p10 }
  0xec   : > { %p1217_p2 = pnand %p1216_p1, %p1212_p11 }
  0xee   : > { %1220 = shalt.err (!%p1217_p2)  }
  0xef   : > { %912 = dma.hbm_to_vmem [thread:$0]  (%p947_p13), %s412_s20, 16, %s414_s10, %s1708_s17 }
  0xf0   : > { %s435_s23 = sadd.s32 1, %s1547_s8  ;;  %s2255_s12 = ssub.s32 1, %s2305_s13 }
  0xf1   : > { %s1904_s15 = sshll.u32 %s2255_s12, 3  ;;  %s419_s1 = scalar_lea.hbm %s2244_s6, %s1883_s16 }
  0xf2   : > { %p1910_p8 = scmp.lt.s32.totalorder %s435_s23, 2  ;;  %s429_s21 = sshll.u32 %s419_s1, 4  ;;  %s430_s21 = int_to_ptr.hbm [resolvable:$true] %s429_s21 }
  0xf3   : > { %s1915_s9 = sadd.s32 8, %s1674_s11  ;;  %s1221_s10 = sshra.s32 %s430_s21, 4  ;;  %s1222_s10 = int_to_ptr.hbm [resolvable:$true] %s1221_s10 }
  0xf4   : > { %s1223_s20 = scalar_lea.hbm %s1222_s10, 1  ;;  %p1228_p7 = scmp.lt.s32.totalorder %s1222_s10, %s2244_s6 }
  0xf5   : > { %p1224_p3 = scmp.ne.s32.totalorder %s1222_s10, %s1223_s20  ;;  %p1229_p9 = scmp.lt.s32.totalorder %s1717_s22, %s1223_s20 }
  0xf7   : > { %p1225_p5 = pnand %p1224_p3, %p947_p13  ;;  %p1230_p10 = por %p1229_p9, %p1228_p7 }
  0xf9   : > { %p1226_p6 = pneg %p1225_p5 }
  0xfb   : > { %p1231_p11 = pnand %p1230_p10, %p1226_p6 }
  0xfd   : > { %1234 = shalt.err (!%p1231_p11)  }
  0xfe   : > { %s1235_s16 = sshra.s32 %s432_s30, 4  ;;  %s1236_s16 = int_to_ptr.vmem [resolvable:$true] %s1235_s16 }
  0xff   : > { %s1237_s23 = scalar_lea.vmem %s1236_s16, 1  ;;  %p1242_p2 = scmp.lt.s32.totalorder %s1236_s16, [#allocation2] }
 0x100   : > { %p1238_p12 = scmp.ne.s32.totalorder %s1236_s16, %s1237_s23  ;;  %p1243_p3 = scmp.lt.s32.totalorder %s1726_s18, %s1237_s23 }
 0x102   : > { %p1239_p0 = pnand %p1238_p12, %p947_p13  ;;  %p1244_p5 = por %p1243_p3, %p1242_p2 }
 0x104   : > { %p1240_p1 = pneg %p1239_p0 }
 0x106   : > { %p1245_p4 = pnand %p1244_p5, %p1240_p1 }
 0x108   : > { %1248 = shalt.err (!%p1245_p4)  }
 0x109   : > { %915 = dma.hbm_to_vmem [thread:$0]  (%p947_p13), %s430_s21, 16, %s432_s30, %s1708_s17 }
 0x10a   : > { %s917_s25 = scalar_select %p1910_p8, [#allocation5], [#allocation50] }
 0x10b   : > { %s918_s27 = scalar_select %p1910_p8, %s1915_s9, 0 }
 0x10c   : > { %s461_s1 = sadd.s32 1, %s1915_s9  ;;  %s1940_s10 = scalar_lea.vmem [#allocation2], %s1904_s15 }
 0x10d   : > { %s443_s8 = sld [smem:[%s917_s25 + %s918_s27]]  ;;  %s457_s20 = sshll.u32 %s1940_s10, 4  ;;  %s1948_s20 = int_to_ptr.vmem [resolvable:$true] %s457_s20 }
 0x10e   : > { %s920_s0 = scalar_select %p1910_p8, [#allocation5], [#allocation51] }
 0x10f   : > { %s2321_s1 = smov (!%p1910_p8, %s461_s1), 0  ;;  %s774_s30 = scalar_lea.vmem %s1940_s10, 1 [#allocation2] }
 0x110   : > { %s1950_s21 = sld [smem:[%s920_s0 + %s2321_s1]]  ;;  %s1957_s25 = sshll.u32 %s774_s30, 4  ;;  %s476_s25 = int_to_ptr.vmem [resolvable:$true] %s1957_s25 }
 0x111   : > { %s479_s12 = sadd.s32 2, %s1915_s9  ;;  %s778_s5 = scalar_lea.vmem %s1940_s10, 2 [#allocation2] }
 0x112   : > { %s2278_s14 = ssub.s32 1, %s2305_s13 }
 0x113   : > { %s444_s23 = scalar_lea.hbm %s2244_s6, %s443_s8  ;;  %s1966_s7 = scalar_lea.sflag [#allocation3], %s2278_s14 }
 0x114   : > { %s1959_s27 = sshll.u32 %s444_s23, 4  ;;  %s456_s27 = int_to_ptr.hbm [resolvable:$true] %s1959_s27 }
 0x115   : > { %s1249_s1 = sshra.s32 %s456_s27, 4  ;;  %s1250_s1 = int_to_ptr.hbm [resolvable:$true] %s1249_s1 }
 0x116   : > { %s1251_s0 = scalar_lea.hbm %s1250_s1, 1  ;;  %p1256_p7 = scmp.lt.s32.totalorder %s1250_s1, %s2244_s6 }
 0x117   : > { %p1252_p4 = scmp.ne.s32.totalorder %s1250_s1, %s1251_s0  ;;  %p1257_p9 = scmp.lt.s32.totalorder %s1717_s22, %s1251_s0 }
 0x119   : > { %p1253_p13 = pnand %p1252_p4, %p1910_p8  ;;  %p1258_p10 = por %p1257_p9, %p1256_p7 }
 0x11b   : > { %p1254_p6 = pneg %p1253_p13 }
 0x11d   : > { %p1259_p11 = pnand %p1258_p10, %p1254_p6 }
 0x11f   : > { %1262 = shalt.err (!%p1259_p11)  }
 0x120   : > { %s1263_s14 = sshra.s32 %s1948_s20, 4  ;;  %s1264_s14 = int_to_ptr.vmem [resolvable:$true] %s1263_s14 }
 0x121   : > { %s1265_s13 = scalar_lea.vmem %s1264_s14, 1  ;;  %p1270_p2 = scmp.lt.s32.totalorder %s1264_s14, [#allocation2] }
 0x122   : > { %p1266_p12 = scmp.ne.s32.totalorder %s1264_s14, %s1265_s13  ;;  %p1271_p3 = scmp.lt.s32.totalorder %s1726_s18, %s1265_s13 }
 0x124   : > { %p1267_p0 = pnand %p1266_p12, %p1910_p8  ;;  %p1272_p5 = por %p1271_p3, %p1270_p2 }
 0x126   : > { %p1268_p1 = pneg %p1267_p0 }
 0x128   : > { %p1273_p4 = pnand %p1272_p5, %p1268_p1 }
 0x12a   : > { %1276 = shalt.err (!%p1273_p4)  }
 0x12b   : > { %919 = dma.hbm_to_vmem [thread:$0]  (%p1910_p8), %s456_s27, 16, %s1948_s20, %s1966_s7 }
 0x12c   : > { %s463_s23 = scalar_lea.hbm %s2244_s6, %s1950_s21  ;;  %s1987_s0 = sshll.u32 %s778_s5, 4 }
 0x12d   : > { %s473_s1 = sshll.u32 %s463_s23, 4  ;;  %2279 = sst [smem:[#allocation69_spill]] %s1987_s0  ;;  %s474_s1 = int_to_ptr.hbm [resolvable:$true] %s473_s1 }
 0x12e   : > { %s497_s16 = sadd.s32 3, %s1915_s9  ;;  %s1277_s8 = sshra.s32 %s474_s1, 4  ;;  %s1278_s8 = int_to_ptr.hbm [resolvable:$true] %s1277_s8 }
 0x12f   : > { %s1279_s14 = scalar_lea.hbm %s1278_s8, 1  ;;  %p1284_p9 = scmp.lt.s32.totalorder %s1278_s8, %s2244_s6 }
 0x130   : > { %p1280_p13 = scmp.ne.s32.totalorder %s1278_s8, %s1279_s14  ;;  %p1285_p10 = scmp.lt.s32.totalorder %s1717_s22, %s1279_s14 }
 0x132   : > { %p1281_p6 = pnand %p1280_p13, %p1910_p8  ;;  %p1286_p11 = por %p1285_p10, %p1284_p9 }
 0x134   : > { %p1282_p7 = pneg %p1281_p6 }
 0x136   : > { %p1287_p12 = pnand %p1286_p11, %p1282_p7 }
 0x138   : > { %1290 = shalt.err (!%p1287_p12)  }
 0x139   : > { %s1291_s20 = sshra.s32 %s476_s25, 4  ;;  %s1292_s20 = int_to_ptr.vmem [resolvable:$true] %s1291_s20 }
 0x13a   : > { %s1293_s5 = scalar_lea.vmem %s1292_s20, 1  ;;  %p1298_p3 = scmp.lt.s32.totalorder %s1292_s20, [#allocation2] }
 0x13b   : > { %p1294_p0 = scmp.ne.s32.totalorder %s1292_s20, %s1293_s5  ;;  %p1299_p5 = scmp.lt.s32.totalorder %s1726_s18, %s1293_s5 }
 0x13d   : > { %p1295_p1 = pnand %p1294_p0, %p1910_p8  ;;  %p1300_p4 = por %p1299_p5, %p1298_p3 }
 0x13f   : > { %p1296_p2 = pneg %p1295_p1 }
 0x141   : > { %p1301_p13 = pnand %p1300_p4, %p1296_p2 }
 0x143   : > { %1304 = shalt.err (!%p1301_p13)  }
 0x144   : > { %922 = dma.hbm_to_vmem [thread:$0]  (%p1910_p8), %s474_s1, 16, %s476_s25, %s1966_s7 }
 0x145   : > { %s2323_s12 = smov (!%p1910_p8, %s479_s12), 0  ;;  %s2325_s16 = smov (!%p1910_p8, %s497_s16), 0 }
 0x146   : > { %s926_s21 = scalar_select %p1910_p8, [#allocation5], [#allocation53] }
 0x147   : > { %s2280_s26 = scalar_select %p1910_p8, [#allocation5], [#allocation52] }
 0x148   : > { %s782_s30 = scalar_lea.vmem %s1940_s10, 3 [#allocation2]  ;;  %s515_s15 = sadd.s32 4, %s1915_s9 }
 0x149   : > { %s480_s27 = sld [smem:[%s2280_s26 + %s2323_s12]]  ;;  %s786_s8 = scalar_lea.vmem %s1940_s10, 4 [#allocation2] }
 0x14a   : > { %s2016_s23 = sld [smem:[%s926_s21 + %s2325_s16]]  ;;  %s2327_s15 = smov (!%p1910_p8, %s515_s15), 0 }
 0x14b   : > { %s929_s25 = scalar_select %p1910_p8, [#allocation5], [#allocation54] }
 0x14c   : > { %s2026_s20 = sshll.u32 %s782_s30, 4  ;;  %s2030_s26 = sshll.u32 %s786_s8, 4  ;;  %s512_s20 = int_to_ptr.vmem [resolvable:$true] %s2026_s20  ;;  %s530_s26 = int_to_ptr.vmem [resolvable:$true] %s2030_s26 }
 0x14d   : > { %s2028_s5 = sld [smem:[%s929_s25 + %s2327_s15]] }
 0x14f   : > { %s481_s13 = scalar_lea.hbm %s2244_s6, %s480_s27 }
 0x150   : > { %s491_s12 = sshll.u32 %s481_s13, 4  ;;  %s492_s12 = int_to_ptr.hbm [resolvable:$true] %s491_s12 }
 0x151   : > { %s1305_s16 = sshra.s32 %s492_s12, 4  ;;  %s1306_s16 = int_to_ptr.hbm [resolvable:$true] %s1305_s16 }
 0x152   : > { %s1307_s21 = scalar_lea.hbm %s1306_s16, 1  ;;  %p1312_p10 = scmp.lt.s32.totalorder %s1306_s16, %s2244_s6 }
 0x153   : > { %p1308_p6 = scmp.ne.s32.totalorder %s1306_s16, %s1307_s21  ;;  %p1313_p11 = scmp.lt.s32.totalorder %s1717_s22, %s1307_s21 }
 0x155   : > { %p1309_p7 = pnand %p1308_p6, %p1910_p8  ;;  %p1314_p12 = por %p1313_p11, %p1312_p10 }
 0x157   : > { %p1310_p9 = pneg %p1309_p7 }
 0x159   : > { %p1315_p0 = pnand %p1314_p12, %p1310_p9 }
 0x15b   : > { %1318 = shalt.err (!%p1315_p0)  }
 0x15c   : > { %s2281_s27 = sld [smem:[#allocation69_spill]] }
 0x162   : > { %s2282_s30 = int_to_ptr.vmem [resolvable:$true] %s2281_s27 }
 0x163   : > { %s1319_s15 = sshra.s32 %s2282_s30, 4  ;;  %s1320_s15 = int_to_ptr.vmem [resolvable:$true] %s1319_s15 }
 0x164   : > { %s1321_s8 = scalar_lea.vmem %s1320_s15, 1  ;;  %p1326_p5 = scmp.lt.s32.totalorder %s1320_s15, [#allocation2] }
 0x165   : > { %p1322_p1 = scmp.ne.s32.totalorder %s1320_s15, %s1321_s8  ;;  %p1327_p4 = scmp.lt.s32.totalorder %s1726_s18, %s1321_s8 }
 0x167   : > { %p1323_p2 = pnand %p1322_p1, %p1910_p8  ;;  %p1328_p13 = por %p1327_p4, %p1326_p5 }
 0x169   : > { %p1324_p3 = pneg %p1323_p2 }
 0x16b   : > { %p1329_p6 = pnand %p1328_p13, %p1324_p3 }
 0x16d   : > { %1332 = shalt.err (!%p1329_p6)  }
 0x16e   : > { %s2283_s4 = smov %s2282_s30  ;;  %s499_s1 = scalar_lea.hbm %s2244_s6, %s2016_s23 }
 0x16f   : > { %925 = dma.hbm_to_vmem [thread:$0]  (%p1910_p8), %s492_s12, 16, %s2283_s4, %s1966_s7 }
 0x170   : > { %s509_s14 = sshll.u32 %s499_s1, 4  ;;  %s790_s13 = scalar_lea.vmem %s1940_s10, 5 [#allocation2]  ;;  %s510_s14 = int_to_ptr.hbm [resolvable:$true] %s509_s14 }
 0x171   : > { %s1333_s16 = sshra.s32 %s510_s14, 4  ;;  %s1334_s16 = int_to_ptr.hbm [resolvable:$true] %s1333_s16 }
 0x172   : > { %s1335_s21 = scalar_lea.hbm %s1334_s16, 1  ;;  %p1340_p11 = scmp.lt.s32.totalorder %s1334_s16, %s2244_s6 }
 0x173   : > { %p1336_p7 = scmp.ne.s32.totalorder %s1334_s16, %s1335_s21  ;;  %p1341_p12 = scmp.lt.s32.totalorder %s1717_s22, %s1335_s21 }
 0x175   : > { %p1337_p9 = pnand %p1336_p7, %p1910_p8  ;;  %p1342_p0 = por %p1341_p12, %p1340_p11 }
 0x177   : > { %p1338_p10 = pneg %p1337_p9 }
 0x179   : > { %p1343_p1 = pnand %p1342_p0, %p1338_p10 }
 0x17b   : > { %1346 = shalt.err (!%p1343_p1)  }
 0x17c   : > { %s1347_s23 = sshra.s32 %s512_s20, 4  ;;  %s1348_s23 = int_to_ptr.vmem [resolvable:$true] %s1347_s23 }
 0x17d   : > { %s1349_s12 = scalar_lea.vmem %s1348_s23, 1  ;;  %p1354_p4 = scmp.lt.s32.totalorder %s1348_s23, [#allocation2] }
 0x17e   : > { %p1350_p2 = scmp.ne.s32.totalorder %s1348_s23, %s1349_s12  ;;  %p1355_p13 = scmp.lt.s32.totalorder %s1726_s18, %s1349_s12 }
 0x180   : > { %p1351_p3 = pnand %p1350_p2, %p1910_p8  ;;  %p1356_p6 = por %p1355_p13, %p1354_p4 }
 0x182   : > { %p1352_p5 = pneg %p1351_p3 }
 0x184   : > { %p1357_p7 = pnand %p1356_p6, %p1352_p5 }
 0x186   : > { %1360 = shalt.err (!%p1357_p7)  }
 0x187   : > { %928 = dma.hbm_to_vmem [thread:$0]  (%p1910_p8), %s510_s14, 16, %s512_s20, %s1966_s7 }
 0x188   : > { %s517_s4 = scalar_lea.hbm %s2244_s6, %s2028_s5  ;;  %s533_s0 = sadd.s32 5, %s1915_s9 }
 0x189   : > { %s527_s25 = sshll.u32 %s517_s4, 4  ;;  %s2072_s1 = sshll.u32 %s790_s13, 4  ;;  %s528_s25 = int_to_ptr.hbm [resolvable:$true] %s527_s25  ;;  %s548_s1 = int_to_ptr.vmem [resolvable:$true] %s2072_s1 }
 0x18a   : > { %s551_s16 = sadd.s32 6, %s1915_s9  ;;  %s1361_s21 = sshra.s32 %s528_s25, 4  ;;  %s1362_s21 = int_to_ptr.hbm [resolvable:$true] %s1361_s21 }
 0x18b   : > { %s1363_s27 = scalar_lea.hbm %s1362_s21, 1  ;;  %p1368_p12 = scmp.lt.s32.totalorder %s1362_s21, %s2244_s6 }
 0x18c   : > { %p1364_p9 = scmp.ne.s32.totalorder %s1362_s21, %s1363_s27  ;;  %p1369_p0 = scmp.lt.s32.totalorder %s1717_s22, %s1363_s27 }
 0x18e   : > { %p1365_p10 = pnand %p1364_p9, %p1910_p8  ;;  %p1370_p1 = por %p1369_p0, %p1368_p12 }
 0x190   : > { %p1366_p11 = pneg %p1365_p10 }
 0x192   : > { %p1371_p2 = pnand %p1370_p1, %p1366_p11 }
 0x194   : > { %1374 = shalt.err (!%p1371_p2)  }
 0x195   : > { %s1375_s20 = sshra.s32 %s530_s26, 4  ;;  %s1376_s20 = int_to_ptr.vmem [resolvable:$true] %s1375_s20 }
 0x196   : > { %s1377_s5 = scalar_lea.vmem %s1376_s20, 1  ;;  %p1382_p13 = scmp.lt.s32.totalorder %s1376_s20, [#allocation2] }
 0x197   : > { %p1378_p3 = scmp.ne.s32.totalorder %s1376_s20, %s1377_s5  ;;  %p1383_p6 = scmp.lt.s32.totalorder %s1726_s18, %s1377_s5 }
 0x199   : > { %p1379_p5 = pnand %p1378_p3, %p1910_p8  ;;  %p1384_p7 = por %p1383_p6, %p1382_p13 }
 0x19b   : > { %p1380_p4 = pneg %p1379_p5 }
 0x19d   : > { %p1385_p9 = pnand %p1384_p7, %p1380_p4 }
 0x19f   : > { %1388 = shalt.err (!%p1385_p9)  }
 0x1a0   : > { %931 = dma.hbm_to_vmem [thread:$0]  (%p1910_p8), %s528_s25, 16, %s530_s26, %s1966_s7 }
 0x1a1   : > { %s932_s14 = scalar_select %p1910_p8, [#allocation5], [#allocation55] }
 0x1a2   : > { %s2329_s0 = smov (!%p1910_p8, %s533_s0), 0  ;;  %s2331_s16 = smov (!%p1910_p8, %s551_s16), 0 }
 0x1a3   : > { %s935_s13 = scalar_select %p1910_p8, [#allocation5], [#allocation56] }
 0x1a4   : > { %s534_s12 = sld [smem:[%s932_s14 + %s2329_s0]]  ;;  %s569_s15 = sadd.s32 7, %s1915_s9 }
 0x1a5   : > { %s2103_s8 = sld [smem:[%s935_s13 + %s2331_s16]]  ;;  %s794_s4 = scalar_lea.vmem %s1940_s10, 6 [#allocation2] }
 0x1a6   : > { %s938_s26 = scalar_select %p1910_p8, [#allocation5], [#allocation57] }
 0x1a7   : > { %s2333_s15 = smov (!%p1910_p8, %s569_s15), 0  ;;  %s2113_s30 = sshll.u32 %s794_s4, 4  ;;  %s566_s30 = int_to_ptr.vmem [resolvable:$true] %s2113_s30 }
 0x1a8   : > { %s2115_s23 = sld [smem:[%s938_s26 + %s2333_s15]]  ;;  %s798_s20 = scalar_lea.vmem %s1940_s10, 7 [#allocation2] }
 0x1aa   : > { %s535_s27 = scalar_lea.hbm %s2244_s6, %s534_s12 }
 0x1ab   : > { %s545_s0 = sshll.u32 %s535_s27, 4  ;;  %s546_s0 = int_to_ptr.hbm [resolvable:$true] %s545_s0 }
 0x1ac   : > { %s1389_s9 = sshra.s32 %s546_s0, 4  ;;  %s1390_s9 = int_to_ptr.hbm [resolvable:$true] %s1389_s9 }
 0x1ad   : > { %s1391_s16 = scalar_lea.hbm %s1390_s9, 1  ;;  %p1396_p0 = scmp.lt.s32.totalorder %s1390_s9, %s2244_s6 }
 0x1ae   : > { %p1392_p10 = scmp.ne.s32.totalorder %s1390_s9, %s1391_s16  ;;  %p1397_p1 = scmp.lt.s32.totalorder %s1717_s22, %s1391_s16 }
 0x1b0   : > { %p1393_p11 = pnand %p1392_p10, %p1910_p8  ;;  %p1398_p2 = por %p1397_p1, %p1396_p0 }
 0x1b2   : > { %p1394_p12 = pneg %p1393_p11 }
 0x1b4   : > { %p1399_p3 = pnand %p1398_p2, %p1394_p12 }
 0x1b6   : > { %1402 = shalt.err (!%p1399_p3)  }
 0x1b7   : > { %s1403_s10 = sshra.s32 %s548_s1, 4  ;;  %s1404_s10 = int_to_ptr.vmem [resolvable:$true] %s1403_s10 }
 0x1b8   : > { %s1405_s13 = scalar_lea.vmem %s1404_s10, 1  ;;  %p1410_p6 = scmp.lt.s32.totalorder %s1404_s10, [#allocation2] }
 0x1b9   : > { %p1406_p5 = scmp.ne.s32.totalorder %s1404_s10, %s1405_s13  ;;  %p1411_p7 = scmp.lt.s32.totalorder %s1726_s18, %s1405_s13 }
 0x1bb   : > { %p1407_p4 = pnand %p1406_p5, %p1910_p8  ;;  %p1412_p9 = por %p1411_p7, %p1410_p6 }
 0x1bd   : > { %p1408_p13 = pneg %p1407_p4 }
 0x1bf   : > { %p1413_p10 = pnand %p1412_p9, %p1408_p13 }
 0x1c1   : > { %1416 = shalt.err (!%p1413_p10)  }
 0x1c2   : > { %934 = dma.hbm_to_vmem [thread:$0]  (%p1910_p8), %s546_s0, 16, %s548_s1, %s1966_s7  ;;  %v1007_v6 = vld [vmem:[%s2241_s3] ss:$0 sm:$0xff]  ;;  %v1004_v7 = vpop.permute.xlu0 %1003 }
 0x1c3   : > { %s553_s4 = scalar_lea.hbm %s2244_s6, %s2103_s8  ;;  %s2141_s25 = sshll.u32 %s798_s20, 4  ;;  %s584_s25 = int_to_ptr.vmem [resolvable:$true] %s2141_s25 }
 0x1c4   : > { %s2139_s26 = sshll.u32 %s553_s4, 4  ;;  %s564_s26 = int_to_ptr.hbm [resolvable:$true] %s2139_s26 }
 0x1c5   : > { %s1417_s9 = sshra.s32 %s564_s26, 4  ;;  %s1418_s9 = int_to_ptr.hbm [resolvable:$true] %s1417_s9 }
 0x1c6   : > { %s1419_s16 = scalar_lea.hbm %s1418_s9, 1  ;;  %p1424_p1 = scmp.lt.s32.totalorder %s1418_s9, %s2244_s6 }
 0x1c7   : > { %p1420_p11 = scmp.ne.s32.totalorder %s1418_s9, %s1419_s16  ;;  %p1425_p2 = scmp.lt.s32.totalorder %s1717_s22, %s1419_s16 }
 0x1c9   : > { %p1421_p12 = pnand %p1420_p11, %p1910_p8  ;;  %p1426_p3 = por %p1425_p2, %p1424_p1 }
 0x1cb   : > { %p1422_p0 = pneg %p1421_p12 }
 0x1cd   : > { %p1427_p5 = pnand %p1426_p3, %p1422_p0 }
 0x1cf   : > { %1430 = shalt.err (!%p1427_p5)  }
 0x1d0   : > { %s1431_s0 = sshra.s32 %s566_s30, 4  ;;  %s1432_s0 = int_to_ptr.vmem [resolvable:$true] %s1431_s0 }
 0x1d1   : > { %s1433_s20 = scalar_lea.vmem %s1432_s0, 1  ;;  %p1438_p7 = scmp.lt.s32.totalorder %s1432_s0, [#allocation2] }
 0x1d2   : > { %p1434_p4 = scmp.ne.s32.totalorder %s1432_s0, %s1433_s20  ;;  %p1439_p9 = scmp.lt.s32.totalorder %s1726_s18, %s1433_s20 }
 0x1d4   : > { %p1435_p13 = pnand %p1434_p4, %p1910_p8  ;;  %p1440_p10 = por %p1439_p9, %p1438_p7 }
 0x1d6   : > { %p1436_p6 = pneg %p1435_p13 }
 0x1d8   : > { %p1441_p11 = pnand %p1440_p10, %p1436_p6 }
 0x1da   : > { %1444 = shalt.err (!%p1441_p11)  }
 0x1db   : > { %937 = dma.hbm_to_vmem [thread:$0]  (%p1910_p8), %s564_s26, 16, %s566_s30, %s1966_s7  ;;  %v1008_v8 = vld [vmem:[%s2241_s3 + $0x1] ss:$0 sm:$0xff]  ;;  %v1006_v9 = vunpack.i.h.bf16 %v1004_v7  ;;  %v1005_v10 = vunpack.i.l.bf16 %v1004_v7 }
 0x1dc   : > { %s571_s12 = scalar_lea.hbm %s2244_s6, %s2115_s23  ;;  %v587_v11 = vld [vmem:[%s2240_s2] sm:$0xff] }
 0x1dd   : > { %s581_s21 = sshll.u32 %s571_s12, 4  ;;  %v599_v12 = vmul.f32 %v1007_v6, %v1005_v10  ;;  %s582_s21 = int_to_ptr.hbm [resolvable:$true] %s581_s21 }
 0x1de   : > { %s1445_s30 = sshra.s32 %s582_s21, 4  ;;  %s1446_s30 = int_to_ptr.hbm [resolvable:$true] %s1445_s30 }
 0x1df   : > { %s1447_s26 = scalar_lea.hbm %s1446_s30, 1  ;;  %p1452_p2 = scmp.lt.s32.totalorder %s1446_s30, %s2244_s6 }
 0x1e0   : > { %p1448_p12 = scmp.ne.s32.totalorder %s1446_s30, %s1447_s26  ;;  %p1453_p3 = scmp.lt.s32.totalorder %s1717_s22, %s1447_s26 }
 0x1e2   : > { %p1449_p0 = pnand %p1448_p12, %p1910_p8  ;;  %p1454_p5 = por %p1453_p3, %p1452_p2 }
 0x1e4   : > { %p1450_p1 = pneg %p1449_p0 }
 0x1e6   : > { %p1455_p4 = pnand %p1454_p5, %p1450_p1 }
 0x1e8   : > { %1458 = shalt.err (!%p1455_p4)  }
 0x1e9   : > { %s1459_s23 = sshra.s32 %s584_s25, 4  ;;  %s1460_s23 = int_to_ptr.vmem [resolvable:$true] %s1459_s23 }
 0x1ea   : > { %s1461_s16 = scalar_lea.vmem %s1460_s23, 1  ;;  %p1466_p9 = scmp.lt.s32.totalorder %s1460_s23, [#allocation2] }
 0x1eb   : > { %p1462_p13 = scmp.ne.s32.totalorder %s1460_s23, %s1461_s16  ;;  %p1467_p10 = scmp.lt.s32.totalorder %s1726_s18, %s1461_s16 }
 0x1ed   : > { %p1463_p6 = pnand %p1462_p13, %p1910_p8  ;;  %p1468_p11 = por %p1467_p10, %p1466_p9 }
 0x1ef   : > { %p1464_p7 = pneg %p1463_p6 }
 0x1f1   : > { %p1469_p12 = pnand %p1468_p11, %p1464_p7 }
 0x1f3   : > { %1472 = shalt.err (!%p1469_p12)  }
 0x1f4   : > { %940 = dma.hbm_to_vmem [thread:$0]  (%p1910_p8), %s582_s21, 16, %s584_s25, %s1966_s7  ;;  %v611_v13 = vmul.f32 %v1008_v8, %v1006_v9  ;;  %v600_v14 = vadd.f32 %v599_v12, %v587_v11 }
 0x1f5   : > { %s260_s22 = scalar_lea.vmem [#allocation6], %s1663_s19 }
 0x1f6   : > { %v612_v15 = vadd.f32 %v611_v13, %v600_v14 }
 0x1f7   : > { %1527 = dma.done.wait %s1708_s17, 128 }
 0x1f8   : > { %1528 = vsyncadd %s1708_s17, 4294967168  ;;  %v633_v16 = vld [vmem:[%s1685_s24] sm:$0xff]  ;;  %s2284_s24 = sld [smem:[#allocation71_spill]]  ;;  %s680_s14 = sshll.u32 %s260_s22, 4  ;;  %s681_s14 = int_to_ptr.vmem [resolvable:$true] %s680_s14 }
 0x1f9   : > { %v634_v17 = vadd.f32 %v633_v16, %v612_v15  ;;  %s2285_s25 = sld [smem:[#allocation73_spill]]  ;;  %s2288_s13 = sand.u32 1, %s1539_s29  }
 0x1fa   : > { %s2286_s8 = sld [smem:[#allocation66_spill]]  ;;  %s667_s12 = scalar_lea.sflag [#allocation7], %s2288_s13 }
 0x1fb   : > { %635 = vadd.xlane.f32.xlu0 %v634_v17  ;;  %s2287_s5 = sld [smem:[#allocation72_spill]] }
 0x1fe   : > { %v1009_v31 = vld [vmem:[%s2284_s24] ss:$0 sm:$0xff] }
 0x1ff   : > { %s678_s1 = scalar_lea.hbm %s2285_s25, %s1674_s11  ;;  %s1493_s30 = scalar_lea.hbm %s2285_s25, 16 }
 0x200   : > { %s682_s10 = sshll.u32 %s678_s1, 4  ;;  %p2289_p0 = scmp.ne.s32.totalorder %s2286_s8, 0  ;;  %s683_s10 = int_to_ptr.hbm [resolvable:$true] %s682_s10 }
 0x201   : > { %v1010_v34 = vld [vmem:[%s2287_s5] ss:$0 sm:$0xff]  ;;  %s1487_s15 = sshra.s32 %s683_s10, 4  ;;  %s1488_s15 = int_to_ptr.hbm [resolvable:$true] %s1487_s15 }
 0x202   : > { %s1489_s11 = scalar_lea.hbm %s1488_s15, 8  ;;  %p1494_p3 = scmp.lt.s32.totalorder %s1488_s15, %s2285_s25 }
 0x203   : > { %p1490_p8 = scmp.ne.s32.totalorder %s1488_s15, %s1489_s11  ;;  %p1495_p5 = scmp.lt.s32.totalorder %s1493_s30, %s1489_s11 }
 0x205   : > { %p1491_p1 = pnand %p1490_p8, %p2289_p0  ;;  %p1496_p4 = por %p1495_p5, %p1494_p3 }
 0x207   : > { %p1492_p2 = pneg %p1491_p1 }
 0x209   : > { %p1497_p13 = pnand %p1496_p4, %p1492_p2 }
 0x26e   : > { %v636_v18 = vpop.xlane.xlu0 %635 }
 0x26f   : > { %v637_v19 = vmul.f32 0.0078125, %v636_v18 }
 0x271   : > { %v638_v20 = vsub.f32 %v634_v17, %v637_v19 }
 0x273   : > { %v639_v21 = vmul.f32 %v638_v20, %v638_v20 }
 0x275   : > { %640 = vadd.xlane.f32.xlu0 %v639_v21 }
 0x2e8   : > { %v641_v22 = vpop.xlane.xlu0 %640 }
 0x2e9   : > { %v642_v23 = vmul.f32 0.0078125, %v641_v22 }
 0x2eb   : > { %v643_v24 = vadd.f32 1e-12, %v642_v23 }
 0x2ed   : > { %1011 = vrsqrt.f32 %v643_v24  ;;  %vm650_vm3 = vweird.f32 %v643_v24 }
 0x2f3   : > { %v1012_v25 = vpop.eup %1011 }
 0x2f4   : > { %v645_v26 = vmul.f32 %v1012_v25, %v643_v24  ;;  %vm651_vm2 = vweird.f32 %v1012_v25 }
 0x2f5   : > { %vm652_vm4 = vmor %vm650_vm3, %vm651_vm2 }
 0x2f6   : > { %v646_v27 = vmul.f32 %v1012_v25, %v645_v26 }
 0x2f8   : > { %v647_v28 = vmul.f32 0.5, %v646_v27 }
 0x2fa   : > { %v648_v29 = vsub.f32 1.5, %v647_v28 }
 0x2fc   : > { %v649_v30 = vmul.f32 %v1012_v25, %v648_v29 }
 0x2fe   : > { %v653_v32 = vsel %vm652_vm4, %v1012_v25, %v649_v30 }
 0x2ff   : > { %v654_v33 = vmul.f32 %v653_v32, %v638_v20 }
 0x301   : > { %v659_v35 = vmul.f32 %v1009_v31, %v654_v33 }
 0x303   : > { %v664_v36 = vadd.f32 %v1010_v34, %v659_v35 }
 0x305   : > { %665 = vst [vmem:[%s260_s22] sm:$0xff] %v664_v36 }
 0x306   : > { %1500 = shalt.err (!%p1497_p13)
}
 0x307   : > { %941 = dma.vmem_to_hbm [thread:$0]  (%p2289_p0), %s681_s14, 128, %s683_s10, %s667_s12  }
 0x308 PF: > { %s2290_s19 = sld [smem:[#allocation64_spill]] }
 0x309   : > { %s2291_s9 = sld [smem:[#allocation61_spill]] }
 0x30a   : > { %s2292_s23 = sld [smem:[#allocation67_spill]] }
 0x30e   : > { %p949_p6 = scmp.ge.s32.totalorder %s2290_s19, 2 }
 0x30f   : > { %s694_s16 = sand.u32 1, %s2291_s9  }
 0x310   : > { %p2293_p7 = scmp.ne.s32.totalorder %s2292_s23, 0  ;;  %s695_s22 = scalar_lea.sflag [#allocation7], %s694_s16 }
 0x312   : > { %p944_p9 = pnand %p949_p6, %p2293_p7 }
 0x314   : > { %p945_p10 = pneg %p944_p9 }
 0x316   : > { %1530 = dma.done.wait (%p945_p10), %s695_s22, 128  }
 0x317   : > { %1532 = vsyncadd (%p945_p10), %s695_s22, 4294967168  ;;  %s28_s10 = sadd.s32 1, %s2290_s19   ;;  %s2294_s7 = sld [smem:[#allocation62_spill]] }
 0x318   : > { %p25_p11 = scmp.ge.s32.totalorder %s28_s10, 4   ;;  %s2295_s30 = sld [smem:[#allocation68_spill]] }
 0x319   : > { %s2296_s8 = sld [smem:[#allocation63_spill]]  ;;  %s2298_s28 = smov %s1539_s29 }
 0x31a   : > { %s2297_s9 = sld [smem:[#allocation65_spill]]  ;;  %27 = sbr.rel (!%p25_p11) target bundleno = 13 (0xd), region = 187 }
 0x31d   : > { %s2299_s29 = smov %s2294_s7 }
 0x31f   :  { %701 = vsyncpa [#allocation7], 1 }
 0x320   :  { %703 = vsyncpa [#allocation7 + $0x1], 1 }
 0x321   :  { %704 = vsyncmov [#allocation3] }
 0x324   :  { %s705_s17 = vpop.sfrf %704 }
 0x325   :  { %p887_p12 = scmp.ne.s32.totalorder %s705_s17, 0 }
 0x327   :  { %709 = shalt.err (%p887_p12)  }
 0x328   :  { %711 = vsyncmov [#allocation3 + $0x1] }
 0x32b   :  { %s712_s24 = vpop.sfrf %711 }
 0x32c   :  { %p888_p8 = scmp.ne.s32.totalorder %s712_s24, 0 }
 0x32e   :  { %716 = shalt.err (%p888_p8)  }

</bundles_post_ra>
